<compile_context>
chip_gen: v6e
topology: v6e:2x2x1
jax: 0.10.0
libtpu: 0.0.40
codegen_flags: <defaults>
</compile_context>

<pallas_src>
import functools

import numpy as np
import jax
import jax.numpy as jnp
from jax.experimental import pallas as pl
from jax.experimental.pallas import tpu as pltpu


def _round_up(x, m):
    return (x + m - 1) // m * m


def _dee_kernel(x_ref, w_all_ref, w2_ref, b2_ref, mask_ref, o_ref, *,
                cq_pad, shifts):
    # x_ref    : (Bt, C, H*W) f32   NCHW with spatial flattened (lane-dense)
    # w_all_ref: (27*Cqp, C)   f32   all-tap conv weights, 1/3 folded in,
    #                                Cq rows zero-padded to Cqp per tap group
    # w2_ref   : (C, Cqp)      f32   FC1 (1x1) weight, input cols zero-padded
    # b2_ref   : (C, 1)        f32   FC1 bias
    # mask_ref : (27, H*W)     f32   per-tap {0,1} spatial-validity masks
    # o_ref    : (Bt, C, H*W)  f32   lane-dense output slab
    bt = x_ref.shape[0]
    hw = x_ref.shape[2]

    # Hoist all small operands out of the loops (JAX does not CSE these).
    w_all = w_all_ref[...]            # (27*Cqp, C)
    w2 = w2_ref[...]                  # (C, Cqp)
    b2 = b2_ref[...]                  # (C, 1)
    masks = mask_ref[...]             # (27, H*W)

    for b in range(bt):               # static unroll over batch elems in block
        x = x_ref[b]                  # (C, H*W), spatial on lanes, no transpose

        # One MXU matmul covering all 27 taps; M = 27*Cqp, K = C, N = H*W.
        z = jnp.dot(w_all, x, preferred_element_type=jnp.float32)

        # Shift-and-accumulate: sublane-aligned tap slices, tiny static lane
        # rolls, mask-multiply (replaces zero padding), VPU adds.
        acc = jnp.zeros((cq_pad, hw), jnp.float32)
        for g, s in enumerate(shifts):
            zg = z[g * cq_pad:(g + 1) * cq_pad, :]      # aligned row block
            if s:
                zg = jnp.roll(zg, -s, axis=1)           # static lane rotate
            acc = acc + zg * masks[g:g + 1, :]

        # 1/3 scale already folded into w_all (positive scale commutes with
        # ReLU), so only the ReLU remains; padded rows of acc are exactly 0.
        hidden = jnp.maximum(acc, 0.0)                   # (Cqp, H*W)

        # 1x1 projection straight into the lane-dense output layout.
        out = jnp.dot(w2, hidden, preferred_element_type=jnp.float32)
        o_ref[b] = out + b2


@functools.partial(jax.jit, static_argnames=("block_b",))
def dee_forward(x_nchw, w11, w12, w13, w1c, b1c, *, block_b=None):
    """x_nchw: (B, C, H, W). Conv weights in PyTorch layout (O, I, kh, kw)."""
    B, C, H, W = x_nchw.shape
    assert C % 4 == 0, "DEE_module requires channel divisible by 4"
    Cq = C // 4
    Cqp = _round_up(Cq, 8)            # pad tap groups to sublane granularity
    HW = H * W

    # Free (layout-preserving) reshape: NCHW and (B, C, H*W) share memory.
    x_flat = x_nchw.reshape(B, C, HW).astype(jnp.float32)

    # ---- repack weights (trace-time, tiny) --------------------------------
    def pack(w):                      # (Cq, C, 3, 3) -> (9, Cq, C), idx kh*3+kw
        return jnp.transpose(w, (2, 3, 0, 1)).reshape(9, Cq, C)

    w_taps = jnp.concatenate([pack(w11), pack(w12), pack(w13)], axis=0) / 3.0
    w_taps = jnp.pad(w_taps, ((0, 0), (0, Cqp - Cq), (0, 0)))   # (27, Cqp, C)
    w_all = w_taps.reshape(27 * Cqp, C).astype(jnp.float32)

    w2 = jnp.pad(w1c[:, :, 0, 0], ((0, 0), (0, Cqp - Cq))).astype(jnp.float32)
    b2 = b1c.reshape(C, 1).astype(jnp.float32)

    # ---- static per-tap lane shifts + validity masks ----------------------
    hh, ww = np.meshgrid(np.arange(H), np.arange(W), indexing="ij")
    shifts, mask_rows = [], []
    for d in (1, 2, 3):
        for kh in range(3):
            for kw in range(3):
                dh, dw = (kh - 1) * d, (kw - 1) * d
                shifts.append(dh * W + dw)
                valid = ((hh + dh >= 0) & (hh + dh < H) &
                         (ww + dw >= 0) & (ww + dw < W))
                mask_rows.append(valid.reshape(-1))
    shifts = tuple(shifts)
    masks = jnp.asarray(np.stack(mask_rows).astype(np.float32))  # (27, HW)

    # ---- batch blocking ----------------------------------------------------
    if block_b is None:
        if B * C * HW * 4 <= (4 << 20):
            block_b = B               # tiny problem: one fat grid step
        else:
            block_b = max(1, B // 2)  # keep >=2 parallel steps (v7x: 2 TCs)
    block_b = max(1, min(block_b, B))
    while B % block_b:
        block_b -= 1
    grid = (B // block_b,)

    kernel = functools.partial(_dee_kernel, cq_pad=Cqp, shifts=shifts)

    out_flat = pl.pallas_call(
        kernel,
        out_shape=jax.ShapeDtypeStruct((B, C, HW), jnp.float32),
        grid_spec=pltpu.PrefetchScalarGridSpec(
            num_scalar_prefetch=0,
            grid=grid,
            in_specs=[
                pl.BlockSpec((block_b, C, HW), lambda b: (b, 0, 0)),
                pl.BlockSpec((27 * Cqp, C), lambda b: (0, 0)),
                pl.BlockSpec((C, Cqp), lambda b: (0, 0)),
                pl.BlockSpec((C, 1), lambda b: (0, 0)),
                pl.BlockSpec((27, HW), lambda b: (0, 0)),
            ],
            out_specs=pl.BlockSpec((block_b, C, HW), lambda b: (b, 0, 0)),
        ),
        compiler_params=pltpu.CompilerParams(
            dimension_semantics=("parallel",)),
    )(x_flat, w_all, w2, b2, masks)

    # Free reshape back to NCHW.
    return out_flat.reshape(B, C, H, W)


def _reference(x, w11, w12, w13, w1c, b1c):
    """Pure-JAX f32 reference (matches the original PyTorch math)."""
    dn = ("NCHW", "OIHW", "NCHW")

    def conv(w, d):
        return jax.lax.conv_general_dilated(
            x, w, window_strides=(1, 1), padding=((d, d), (d, d)),
            rhs_dilation=(d, d), dimension_numbers=dn)

    y = (conv(w11, 1) + conv(w12, 2) + conv(w13, 3)) / 3.0
    h = jax.nn.relu(y)
    out = jax.lax.conv_general_dilated(
        h, w1c, (1, 1), ((0, 0), (0, 0)), dimension_numbers=dn)
    return out + b1c.reshape(1, -1, 1, 1)


if __name__ == "__main__":
    # Small shapes consistent with the module (channel divisible by 4).
    B, C, H, W = 2, 16, 16, 16
    Cq = C // 4

    key = jax.random.PRNGKey(0)
    kx, k11, k12, k13, k1w, k1b = jax.random.split(key, 6)

    x = jax.random.normal(kx, (B, C, H, W), jnp.float32)

    # Kaiming-normal-style init (fan_in, a=0): std = sqrt(2 / fan_in).
    std3 = (2.0 / (C * 3 * 3)) ** 0.5
    w11 = std3 * jax.random.normal(k11, (Cq, C, 3, 3), jnp.float32)
    w12 = std3 * jax.random.normal(k12, (Cq, C, 3, 3), jnp.float32)
    w13 = std3 * jax.random.normal(k13, (Cq, C, 3, 3), jnp.float32)
    std1 = (2.0 / Cq) ** 0.5
    w1c = std1 * jax.random.normal(k1w, (C, Cq, 1, 1), jnp.float32)
    b1c = 0.01 * jax.random.normal(k1b, (C,), jnp.float32)

    out = dee_forward(x, w11, w12, w13, w1c, b1c)
    jax.block_until_ready(out)

    ref = _reference(x, w11, w12, w13, w1c, b1c)
    assert out.shape == (B, C, H, W)
    assert jnp.allclose(out, ref, atol=1e-3, rtol=1e-3), "mismatch vs. JAX reference"

    print("KERNEL_OK")
</pallas_src>

<mosaic_0001>
module attributes {stable_mosaic.version = 11 : i64} {
  func.func @_dee_kernel(%arg0: i32, %arg1: memref<2x16x256xf32, #tpu.memory_space<vmem>>, %arg2: memref<216x16xf32, #tpu.memory_space<vmem>>, %arg3: memref<16x8xf32, #tpu.memory_space<vmem>>, %arg4: memref<16x1xf32, #tpu.memory_space<vmem>>, %arg5: memref<27x256xf32, #tpu.memory_space<vmem>>, %arg6: memref<2x16x256xf32, #tpu.memory_space<vmem>>) attributes {dimension_semantics = [#tpu.dimension_semantics<parallel>], iteration_bounds = array<i64: 1>, scalar_prefetch = 0 : i64, scratch_operands = 0 : i64, tpu.core_type = #tpu.core_type<tc>, window_params = [{transform_indices = @transform_0, window_bounds = array<i64: 2, 16, 256>}, {pipeline_mode = #tpu.pipeline_mode<synchronous>, transform_indices = @transform_1, window_bounds = array<i64: 216, 16>}, {pipeline_mode = #tpu.pipeline_mode<synchronous>, transform_indices = @transform_2, window_bounds = array<i64: 16, 8>}, {pipeline_mode = #tpu.pipeline_mode<synchronous>, transform_indices = @transform_3, window_bounds = array<i64: 16, 1>}, {pipeline_mode = #tpu.pipeline_mode<synchronous>, transform_indices = @transform_4, window_bounds = array<i64: 27, 256>}, {transform_indices = @transform_5, window_bounds = array<i64: 2, 16, 256>}]} {
    %c0 = arith.constant 0 : index
    %c0_0 = arith.constant 0 : index
    %0 = vector.load %arg2[%c0, %c0_0] : memref<216x16xf32, #tpu.memory_space<vmem>>, vector<216x16xf32>
    %c0_1 = arith.constant 0 : index
    %c0_2 = arith.constant 0 : index
    %1 = vector.load %arg3[%c0_1, %c0_2] : memref<16x8xf32, #tpu.memory_space<vmem>>, vector<16x8xf32>
    %c0_3 = arith.constant 0 : index
    %c0_4 = arith.constant 0 : index
    %2 = vector.load %arg4[%c0_3, %c0_4] : memref<16x1xf32, #tpu.memory_space<vmem>>, vector<16x1xf32>
    %c0_5 = arith.constant 0 : index
    %c0_6 = arith.constant 0 : index
    %3 = vector.load %arg5[%c0_5, %c0_6] : memref<27x256xf32, #tpu.memory_space<vmem>>, vector<27x256xf32>
    %c0_7 = arith.constant 0 : index
    %c0_8 = arith.constant 0 : index
    %c0_9 = arith.constant 0 : index
    %4 = vector.load %arg1[%c0_7, %c0_8, %c0_9] : memref<2x16x256xf32, #tpu.memory_space<vmem>>, vector<1x16x256xf32>
    %5 = vector.shape_cast %4 : vector<1x16x256xf32> to vector<16x256xf32>
    %cst = arith.constant dense<0.000000e+00> : vector<216x256xf32>
    %6 = tpu.matmul %0, %5, %cst {dimension_numbers = #tpu.dot_dimension_numbers<[1], [0], [0], [1], [0, 0, 1, 1], [], []>} : vector<216x16xf32>, vector<16x256xf32>, vector<216x256xf32> -> vector<216x256xf32>
    %cst_10 = arith.constant 0.000000e+00 : f32
    %7 = vector.broadcast %cst_10 : f32 to vector<8x256xf32>
    %8 = vector.extract_strided_slice %6 {offsets = [0, 0], sizes = [8, 256], strides = [1, 1]} : vector<216x256xf32> to vector<8x256xf32>
    %9 = vector.extract_strided_slice %8 {offsets = [0, 239], sizes = [8, 17], strides = [1, 1]} : vector<8x256xf32> to vector<8x17xf32>
    %10 = vector.extract_strided_slice %8 {offsets = [0, 0], sizes = [8, 239], strides = [1, 1]} : vector<8x256xf32> to vector<8x239xf32>
    %11 = tpu.concatenate %9, %10 in 1 : vector<8x17xf32>, vector<8x239xf32> -> vector<8x256xf32>
    %12 = vector.extract_strided_slice %3 {offsets = [0, 0], sizes = [1, 256], strides = [1, 1]} : vector<27x256xf32> to vector<1x256xf32>
    %13 = vector.broadcast %12 : vector<1x256xf32> to vector<8x256xf32>
    %14 = arith.mulf %11, %13 : vector<8x256xf32>
    %15 = arith.addf %7, %14 : vector<8x256xf32>
    %16 = vector.extract_strided_slice %6 {offsets = [8, 0], sizes = [8, 256], strides = [1, 1]} : vector<216x256xf32> to vector<8x256xf32>
    %17 = vector.extract_strided_slice %16 {offsets = [0, 240], sizes = [8, 16], strides = [1, 1]} : vector<8x256xf32> to vector<8x16xf32>
    %18 = vector.extract_strided_slice %16 {offsets = [0, 0], sizes = [8, 240], strides = [1, 1]} : vector<8x256xf32> to vector<8x240xf32>
    %19 = tpu.concatenate %17, %18 in 1 : vector<8x16xf32>, vector<8x240xf32> -> vector<8x256xf32>
    %20 = vector.extract_strided_slice %3 {offsets = [1, 0], sizes = [1, 256], strides = [1, 1]} : vector<27x256xf32> to vector<1x256xf32>
    %21 = vector.broadcast %20 : vector<1x256xf32> to vector<8x256xf32>
    %22 = arith.mulf %19, %21 : vector<8x256xf32>
    %23 = arith.addf %15, %22 : vector<8x256xf32>
    %24 = vector.extract_strided_slice %6 {offsets = [16, 0], sizes = [8, 256], strides = [1, 1]} : vector<216x256xf32> to vector<8x256xf32>
    %25 = vector.extract_strided_slice %24 {offsets = [0, 241], sizes = [8, 15], strides = [1, 1]} : vector<8x256xf32> to vector<8x15xf32>
    %26 = vector.extract_strided_slice %24 {offsets = [0, 0], sizes = [8, 241], strides = [1, 1]} : vector<8x256xf32> to vector<8x241xf32>
    %27 = tpu.concatenate %25, %26 in 1 : vector<8x15xf32>, vector<8x241xf32> -> vector<8x256xf32>
    %28 = vector.extract_strided_slice %3 {offsets = [2, 0], sizes = [1, 256], strides = [1, 1]} : vector<27x256xf32> to vector<1x256xf32>
    %29 = vector.broadcast %28 : vector<1x256xf32> to vector<8x256xf32>
    %30 = arith.mulf %27, %29 : vector<8x256xf32>
    %31 = arith.addf %23, %30 : vector<8x256xf32>
    %32 = vector.extract_strided_slice %6 {offsets = [24, 0], sizes = [8, 256], strides = [1, 1]} : vector<216x256xf32> to vector<8x256xf32>
    %33 = vector.extract_strided_slice %32 {offsets = [0, 255], sizes = [8, 1], strides = [1, 1]} : vector<8x256xf32> to vector<8x1xf32>
    %34 = vector.extract_strided_slice %32 {offsets = [0, 0], sizes = [8, 255], strides = [1, 1]} : vector<8x256xf32> to vector<8x255xf32>
    %35 = tpu.concatenate %33, %34 in 1 : vector<8x1xf32>, vector<8x255xf32> -> vector<8x256xf32>
    %36 = vector.extract_strided_slice %3 {offsets = [3, 0], sizes = [1, 256], strides = [1, 1]} : vector<27x256xf32> to vector<1x256xf32>
    %37 = vector.broadcast %36 : vector<1x256xf32> to vector<8x256xf32>
    %38 = arith.mulf %35, %37 : vector<8x256xf32>
    %39 = arith.addf %31, %38 : vector<8x256xf32>
    %40 = vector.extract_strided_slice %6 {offsets = [32, 0], sizes = [8, 256], strides = [1, 1]} : vector<216x256xf32> to vector<8x256xf32>
    %41 = vector.extract_strided_slice %3 {offsets = [4, 0], sizes = [1, 256], strides = [1, 1]} : vector<27x256xf32> to vector<1x256xf32>
    %42 = vector.broadcast %41 : vector<1x256xf32> to vector<8x256xf32>
    %43 = arith.mulf %40, %42 : vector<8x256xf32>
    %44 = arith.addf %39, %43 : vector<8x256xf32>
    %45 = vector.extract_strided_slice %6 {offsets = [40, 0], sizes = [8, 256], strides = [1, 1]} : vector<216x256xf32> to vector<8x256xf32>
    %46 = vector.extract_strided_slice %45 {offsets = [0, 1], sizes = [8, 255], strides = [1, 1]} : vector<8x256xf32> to vector<8x255xf32>
    %47 = vector.extract_strided_slice %45 {offsets = [0, 0], sizes = [8, 1], strides = [1, 1]} : vector<8x256xf32> to vector<8x1xf32>
    %48 = tpu.concatenate %46, %47 in 1 : vector<8x255xf32>, vector<8x1xf32> -> vector<8x256xf32>
    %49 = vector.extract_strided_slice %3 {offsets = [5, 0], sizes = [1, 256], strides = [1, 1]} : vector<27x256xf32> to vector<1x256xf32>
    %50 = vector.broadcast %49 : vector<1x256xf32> to vector<8x256xf32>
    %51 = arith.mulf %48, %50 : vector<8x256xf32>
    %52 = arith.addf %44, %51 : vector<8x256xf32>
    %53 = vector.extract_strided_slice %6 {offsets = [48, 0], sizes = [8, 256], strides = [1, 1]} : vector<216x256xf32> to vector<8x256xf32>
    %54 = vector.extract_strided_slice %53 {offsets = [0, 15], sizes = [8, 241], strides = [1, 1]} : vector<8x256xf32> to vector<8x241xf32>
    %55 = vector.extract_strided_slice %53 {offsets = [0, 0], sizes = [8, 15], strides = [1, 1]} : vector<8x256xf32> to vector<8x15xf32>
    %56 = tpu.concatenate %54, %55 in 1 : vector<8x241xf32>, vector<8x15xf32> -> vector<8x256xf32>
    %57 = vector.extract_strided_slice %3 {offsets = [6, 0], sizes = [1, 256], strides = [1, 1]} : vector<27x256xf32> to vector<1x256xf32>
    %58 = vector.broadcast %57 : vector<1x256xf32> to vector<8x256xf32>
    %59 = arith.mulf %56, %58 : vector<8x256xf32>
    %60 = arith.addf %52, %59 : vector<8x256xf32>
    %61 = vector.extract_strided_slice %6 {offsets = [56, 0], sizes = [8, 256], strides = [1, 1]} : vector<216x256xf32> to vector<8x256xf32>
    %62 = vector.extract_strided_slice %61 {offsets = [0, 16], sizes = [8, 240], strides = [1, 1]} : vector<8x256xf32> to vector<8x240xf32>
    %63 = vector.extract_strided_slice %61 {offsets = [0, 0], sizes = [8, 16], strides = [1, 1]} : vector<8x256xf32> to vector<8x16xf32>
    %64 = tpu.concatenate %62, %63 in 1 : vector<8x240xf32>, vector<8x16xf32> -> vector<8x256xf32>
    %65 = vector.extract_strided_slice %3 {offsets = [7, 0], sizes = [1, 256], strides = [1, 1]} : vector<27x256xf32> to vector<1x256xf32>
    %66 = vector.broadcast %65 : vector<1x256xf32> to vector<8x256xf32>
    %67 = arith.mulf %64, %66 : vector<8x256xf32>
    %68 = arith.addf %60, %67 : vector<8x256xf32>
    %69 = vector.extract_strided_slice %6 {offsets = [64, 0], sizes = [8, 256], strides = [1, 1]} : vector<216x256xf32> to vector<8x256xf32>
    %70 = vector.extract_strided_slice %69 {offsets = [0, 17], sizes = [8, 239], strides = [1, 1]} : vector<8x256xf32> to vector<8x239xf32>
    %71 = vector.extract_strided_slice %69 {offsets = [0, 0], sizes = [8, 17], strides = [1, 1]} : vector<8x256xf32> to vector<8x17xf32>
    %72 = tpu.concatenate %70, %71 in 1 : vector<8x239xf32>, vector<8x17xf32> -> vector<8x256xf32>
    %73 = vector.extract_strided_slice %3 {offsets = [8, 0], sizes = [1, 256], strides = [1, 1]} : vector<27x256xf32> to vector<1x256xf32>
    %74 = vector.broadcast %73 : vector<1x256xf32> to vector<8x256xf32>
    %75 = arith.mulf %72, %74 : vector<8x256xf32>
    %76 = arith.addf %68, %75 : vector<8x256xf32>
    %77 = vector.extract_strided_slice %6 {offsets = [72, 0], sizes = [8, 256], strides = [1, 1]} : vector<216x256xf32> to vector<8x256xf32>
    %78 = vector.extract_strided_slice %77 {offsets = [0, 222], sizes = [8, 34], strides = [1, 1]} : vector<8x256xf32> to vector<8x34xf32>
    %79 = vector.extract_strided_slice %77 {offsets = [0, 0], sizes = [8, 222], strides = [1, 1]} : vector<8x256xf32> to vector<8x222xf32>
    %80 = tpu.concatenate %78, %79 in 1 : vector<8x34xf32>, vector<8x222xf32> -> vector<8x256xf32>
    %81 = vector.extract_strided_slice %3 {offsets = [9, 0], sizes = [1, 256], strides = [1, 1]} : vector<27x256xf32> to vector<1x256xf32>
    %82 = vector.broadcast %81 : vector<1x256xf32> to vector<8x256xf32>
    %83 = arith.mulf %80, %82 : vector<8x256xf32>
    %84 = arith.addf %76, %83 : vector<8x256xf32>
    %85 = vector.extract_strided_slice %6 {offsets = [80, 0], sizes = [8, 256], strides = [1, 1]} : vector<216x256xf32> to vector<8x256xf32>
    %86 = vector.extract_strided_slice %85 {offsets = [0, 224], sizes = [8, 32], strides = [1, 1]} : vector<8x256xf32> to vector<8x32xf32>
    %87 = vector.extract_strided_slice %85 {offsets = [0, 0], sizes = [8, 224], strides = [1, 1]} : vector<8x256xf32> to vector<8x224xf32>
    %88 = tpu.concatenate %86, %87 in 1 : vector<8x32xf32>, vector<8x224xf32> -> vector<8x256xf32>
    %89 = vector.extract_strided_slice %3 {offsets = [10, 0], sizes = [1, 256], strides = [1, 1]} : vector<27x256xf32> to vector<1x256xf32>
    %90 = vector.broadcast %89 : vector<1x256xf32> to vector<8x256xf32>
    %91 = arith.mulf %88, %90 : vector<8x256xf32>
    %92 = arith.addf %84, %91 : vector<8x256xf32>
    %93 = vector.extract_strided_slice %6 {offsets = [88, 0], sizes = [8, 256], strides = [1, 1]} : vector<216x256xf32> to vector<8x256xf32>
    %94 = vector.extract_strided_slice %93 {offsets = [0, 226], sizes = [8, 30], strides = [1, 1]} : vector<8x256xf32> to vector<8x30xf32>
    %95 = vector.extract_strided_slice %93 {offsets = [0, 0], sizes = [8, 226], strides = [1, 1]} : vector<8x256xf32> to vector<8x226xf32>
    %96 = tpu.concatenate %94, %95 in 1 : vector<8x30xf32>, vector<8x226xf32> -> vector<8x256xf32>
    %97 = vector.extract_strided_slice %3 {offsets = [11, 0], sizes = [1, 256], strides = [1, 1]} : vector<27x256xf32> to vector<1x256xf32>
    %98 = vector.broadcast %97 : vector<1x256xf32> to vector<8x256xf32>
    %99 = arith.mulf %96, %98 : vector<8x256xf32>
    %100 = arith.addf %92, %99 : vector<8x256xf32>
    %101 = vector.extract_strided_slice %6 {offsets = [96, 0], sizes = [8, 256], strides = [1, 1]} : vector<216x256xf32> to vector<8x256xf32>
    %102 = vector.extract_strided_slice %101 {offsets = [0, 254], sizes = [8, 2], strides = [1, 1]} : vector<8x256xf32> to vector<8x2xf32>
    %103 = vector.extract_strided_slice %101 {offsets = [0, 0], sizes = [8, 254], strides = [1, 1]} : vector<8x256xf32> to vector<8x254xf32>
    %104 = tpu.concatenate %102, %103 in 1 : vector<8x2xf32>, vector<8x254xf32> -> vector<8x256xf32>
    %105 = vector.extract_strided_slice %3 {offsets = [12, 0], sizes = [1, 256], strides = [1, 1]} : vector<27x256xf32> to vector<1x256xf32>
    %106 = vector.broadcast %105 : vector<1x256xf32> to vector<8x256xf32>
    %107 = arith.mulf %104, %106 : vector<8x256xf32>
    %108 = arith.addf %100, %107 : vector<8x256xf32>
    %109 = vector.extract_strided_slice %6 {offsets = [104, 0], sizes = [8, 256], strides = [1, 1]} : vector<216x256xf32> to vector<8x256xf32>
    %110 = vector.extract_strided_slice %3 {offsets = [13, 0], sizes = [1, 256], strides = [1, 1]} : vector<27x256xf32> to vector<1x256xf32>
    %111 = vector.broadcast %110 : vector<1x256xf32> to vector<8x256xf32>
    %112 = arith.mulf %109, %111 : vector<8x256xf32>
    %113 = arith.addf %108, %112 : vector<8x256xf32>
    %114 = vector.extract_strided_slice %6 {offsets = [112, 0], sizes = [8, 256], strides = [1, 1]} : vector<216x256xf32> to vector<8x256xf32>
    %115 = vector.extract_strided_slice %114 {offsets = [0, 2], sizes = [8, 254], strides = [1, 1]} : vector<8x256xf32> to vector<8x254xf32>
    %116 = vector.extract_strided_slice %114 {offsets = [0, 0], sizes = [8, 2], strides = [1, 1]} : vector<8x256xf32> to vector<8x2xf32>
    %117 = tpu.concatenate %115, %116 in 1 : vector<8x254xf32>, vector<8x2xf32> -> vector<8x256xf32>
    %118 = vector.extract_strided_slice %3 {offsets = [14, 0], sizes = [1, 256], strides = [1, 1]} : vector<27x256xf32> to vector<1x256xf32>
    %119 = vector.broadcast %118 : vector<1x256xf32> to vector<8x256xf32>
    %120 = arith.mulf %117, %119 : vector<8x256xf32>
    %121 = arith.addf %113, %120 : vector<8x256xf32>
    %122 = vector.extract_strided_slice %6 {offsets = [120, 0], sizes = [8, 256], strides = [1, 1]} : vector<216x256xf32> to vector<8x256xf32>
    %123 = vector.extract_strided_slice %122 {offsets = [0, 30], sizes = [8, 226], strides = [1, 1]} : vector<8x256xf32> to vector<8x226xf32>
    %124 = vector.extract_strided_slice %122 {offsets = [0, 0], sizes = [8, 30], strides = [1, 1]} : vector<8x256xf32> to vector<8x30xf32>
    %125 = tpu.concatenate %123, %124 in 1 : vector<8x226xf32>, vector<8x30xf32> -> vector<8x256xf32>
    %126 = vector.extract_strided_slice %3 {offsets = [15, 0], sizes = [1, 256], strides = [1, 1]} : vector<27x256xf32> to vector<1x256xf32>
    %127 = vector.broadcast %126 : vector<1x256xf32> to vector<8x256xf32>
    %128 = arith.mulf %125, %127 : vector<8x256xf32>
    %129 = arith.addf %121, %128 : vector<8x256xf32>
    %130 = vector.extract_strided_slice %6 {offsets = [128, 0], sizes = [8, 256], strides = [1, 1]} : vector<216x256xf32> to vector<8x256xf32>
    %131 = vector.extract_strided_slice %130 {offsets = [0, 32], sizes = [8, 224], strides = [1, 1]} : vector<8x256xf32> to vector<8x224xf32>
    %132 = vector.extract_strided_slice %130 {offsets = [0, 0], sizes = [8, 32], strides = [1, 1]} : vector<8x256xf32> to vector<8x32xf32>
    %133 = tpu.concatenate %131, %132 in 1 : vector<8x224xf32>, vector<8x32xf32> -> vector<8x256xf32>
    %134 = vector.extract_strided_slice %3 {offsets = [16, 0], sizes = [1, 256], strides = [1, 1]} : vector<27x256xf32> to vector<1x256xf32>
    %135 = vector.broadcast %134 : vector<1x256xf32> to vector<8x256xf32>
    %136 = arith.mulf %133, %135 : vector<8x256xf32>
    %137 = arith.addf %129, %136 : vector<8x256xf32>
    %138 = vector.extract_strided_slice %6 {offsets = [136, 0], sizes = [8, 256], strides = [1, 1]} : vector<216x256xf32> to vector<8x256xf32>
    %139 = vector.extract_strided_slice %138 {offsets = [0, 34], sizes = [8, 222], strides = [1, 1]} : vector<8x256xf32> to vector<8x222xf32>
    %140 = vector.extract_strided_slice %138 {offsets = [0, 0], sizes = [8, 34], strides = [1, 1]} : vector<8x256xf32> to vector<8x34xf32>
    %141 = tpu.concatenate %139, %140 in 1 : vector<8x222xf32>, vector<8x34xf32> -> vector<8x256xf32>
    %142 = vector.extract_strided_slice %3 {offsets = [17, 0], sizes = [1, 256], strides = [1, 1]} : vector<27x256xf32> to vector<1x256xf32>
    %143 = vector.broadcast %142 : vector<1x256xf32> to vector<8x256xf32>
    %144 = arith.mulf %141, %143 : vector<8x256xf32>
    %145 = arith.addf %137, %144 : vector<8x256xf32>
    %146 = vector.extract_strided_slice %6 {offsets = [144, 0], sizes = [8, 256], strides = [1, 1]} : vector<216x256xf32> to vector<8x256xf32>
    %147 = vector.extract_strided_slice %146 {offsets = [0, 205], sizes = [8, 51], strides = [1, 1]} : vector<8x256xf32> to vector<8x51xf32>
    %148 = vector.extract_strided_slice %146 {offsets = [0, 0], sizes = [8, 205], strides = [1, 1]} : vector<8x256xf32> to vector<8x205xf32>
    %149 = tpu.concatenate %147, %148 in 1 : vector<8x51xf32>, vector<8x205xf32> -> vector<8x256xf32>
    %150 = vector.extract_strided_slice %3 {offsets = [18, 0], sizes = [1, 256], strides = [1, 1]} : vector<27x256xf32> to vector<1x256xf32>
    %151 = vector.broadcast %150 : vector<1x256xf32> to vector<8x256xf32>
    %152 = arith.mulf %149, %151 : vector<8x256xf32>
    %153 = arith.addf %145, %152 : vector<8x256xf32>
    %154 = vector.extract_strided_slice %6 {offsets = [152, 0], sizes = [8, 256], strides = [1, 1]} : vector<216x256xf32> to vector<8x256xf32>
    %155 = vector.extract_strided_slice %154 {offsets = [0, 208], sizes = [8, 48], strides = [1, 1]} : vector<8x256xf32> to vector<8x48xf32>
    %156 = vector.extract_strided_slice %154 {offsets = [0, 0], sizes = [8, 208], strides = [1, 1]} : vector<8x256xf32> to vector<8x208xf32>
    %157 = tpu.concatenate %155, %156 in 1 : vector<8x48xf32>, vector<8x208xf32> -> vector<8x256xf32>
    %158 = vector.extract_strided_slice %3 {offsets = [19, 0], sizes = [1, 256], strides = [1, 1]} : vector<27x256xf32> to vector<1x256xf32>
    %159 = vector.broadcast %158 : vector<1x256xf32> to vector<8x256xf32>
    %160 = arith.mulf %157, %159 : vector<8x256xf32>
    %161 = arith.addf %153, %160 : vector<8x256xf32>
    %162 = vector.extract_strided_slice %6 {offsets = [160, 0], sizes = [8, 256], strides = [1, 1]} : vector<216x256xf32> to vector<8x256xf32>
    %163 = vector.extract_strided_slice %162 {offsets = [0, 211], sizes = [8, 45], strides = [1, 1]} : vector<8x256xf32> to vector<8x45xf32>
    %164 = vector.extract_strided_slice %162 {offsets = [0, 0], sizes = [8, 211], strides = [1, 1]} : vector<8x256xf32> to vector<8x211xf32>
    %165 = tpu.concatenate %163, %164 in 1 : vector<8x45xf32>, vector<8x211xf32> -> vector<8x256xf32>
    %166 = vector.extract_strided_slice %3 {offsets = [20, 0], sizes = [1, 256], strides = [1, 1]} : vector<27x256xf32> to vector<1x256xf32>
    %167 = vector.broadcast %166 : vector<1x256xf32> to vector<8x256xf32>
    %168 = arith.mulf %165, %167 : vector<8x256xf32>
    %169 = arith.addf %161, %168 : vector<8x256xf32>
    %170 = vector.extract_strided_slice %6 {offsets = [168, 0], sizes = [8, 256], strides = [1, 1]} : vector<216x256xf32> to vector<8x256xf32>
    %171 = vector.extract_strided_slice %170 {offsets = [0, 253], sizes = [8, 3], strides = [1, 1]} : vector<8x256xf32> to vector<8x3xf32>
    %172 = vector.extract_strided_slice %170 {offsets = [0, 0], sizes = [8, 253], strides = [1, 1]} : vector<8x256xf32> to vector<8x253xf32>
    %173 = tpu.concatenate %171, %172 in 1 : vector<8x3xf32>, vector<8x253xf32> -> vector<8x256xf32>
    %174 = vector.extract_strided_slice %3 {offsets = [21, 0], sizes = [1, 256], strides = [1, 1]} : vector<27x256xf32> to vector<1x256xf32>
    %175 = vector.broadcast %174 : vector<1x256xf32> to vector<8x256xf32>
    %176 = arith.mulf %173, %175 : vector<8x256xf32>
    %177 = arith.addf %169, %176 : vector<8x256xf32>
    %178 = vector.extract_strided_slice %6 {offsets = [176, 0], sizes = [8, 256], strides = [1, 1]} : vector<216x256xf32> to vector<8x256xf32>
    %179 = vector.extract_strided_slice %3 {offsets = [22, 0], sizes = [1, 256], strides = [1, 1]} : vector<27x256xf32> to vector<1x256xf32>
    %180 = vector.broadcast %179 : vector<1x256xf32> to vector<8x256xf32>
    %181 = arith.mulf %178, %180 : vector<8x256xf32>
    %182 = arith.addf %177, %181 : vector<8x256xf32>
    %183 = vector.extract_strided_slice %6 {offsets = [184, 0], sizes = [8, 256], strides = [1, 1]} : vector<216x256xf32> to vector<8x256xf32>
    %184 = vector.extract_strided_slice %183 {offsets = [0, 3], sizes = [8, 253], strides = [1, 1]} : vector<8x256xf32> to vector<8x253xf32>
    %185 = vector.extract_strided_slice %183 {offsets = [0, 0], sizes = [8, 3], strides = [1, 1]} : vector<8x256xf32> to vector<8x3xf32>
    %186 = tpu.concatenate %184, %185 in 1 : vector<8x253xf32>, vector<8x3xf32> -> vector<8x256xf32>
    %187 = vector.extract_strided_slice %3 {offsets = [23, 0], sizes = [1, 256], strides = [1, 1]} : vector<27x256xf32> to vector<1x256xf32>
    %188 = vector.broadcast %187 : vector<1x256xf32> to vector<8x256xf32>
    %189 = arith.mulf %186, %188 : vector<8x256xf32>
    %190 = arith.addf %182, %189 : vector<8x256xf32>
    %191 = vector.extract_strided_slice %6 {offsets = [192, 0], sizes = [8, 256], strides = [1, 1]} : vector<216x256xf32> to vector<8x256xf32>
    %192 = vector.extract_strided_slice %191 {offsets = [0, 45], sizes = [8, 211], strides = [1, 1]} : vector<8x256xf32> to vector<8x211xf32>
    %193 = vector.extract_strided_slice %191 {offsets = [0, 0], sizes = [8, 45], strides = [1, 1]} : vector<8x256xf32> to vector<8x45xf32>
    %194 = tpu.concatenate %192, %193 in 1 : vector<8x211xf32>, vector<8x45xf32> -> vector<8x256xf32>
    %195 = vector.extract_strided_slice %3 {offsets = [24, 0], sizes = [1, 256], strides = [1, 1]} : vector<27x256xf32> to vector<1x256xf32>
    %196 = vector.broadcast %195 : vector<1x256xf32> to vector<8x256xf32>
    %197 = arith.mulf %194, %196 : vector<8x256xf32>
    %198 = arith.addf %190, %197 : vector<8x256xf32>
    %199 = vector.extract_strided_slice %6 {offsets = [200, 0], sizes = [8, 256], strides = [1, 1]} : vector<216x256xf32> to vector<8x256xf32>
    %200 = vector.extract_strided_slice %199 {offsets = [0, 48], sizes = [8, 208], strides = [1, 1]} : vector<8x256xf32> to vector<8x208xf32>
    %201 = vector.extract_strided_slice %199 {offsets = [0, 0], sizes = [8, 48], strides = [1, 1]} : vector<8x256xf32> to vector<8x48xf32>
    %202 = tpu.concatenate %200, %201 in 1 : vector<8x208xf32>, vector<8x48xf32> -> vector<8x256xf32>
    %203 = vector.extract_strided_slice %3 {offsets = [25, 0], sizes = [1, 256], strides = [1, 1]} : vector<27x256xf32> to vector<1x256xf32>
    %204 = vector.broadcast %203 : vector<1x256xf32> to vector<8x256xf32>
    %205 = arith.mulf %202, %204 : vector<8x256xf32>
    %206 = arith.addf %198, %205 : vector<8x256xf32>
    %207 = vector.extract_strided_slice %6 {offsets = [208, 0], sizes = [8, 256], strides = [1, 1]} : vector<216x256xf32> to vector<8x256xf32>
    %208 = vector.extract_strided_slice %207 {offsets = [0, 51], sizes = [8, 205], strides = [1, 1]} : vector<8x256xf32> to vector<8x205xf32>
    %209 = vector.extract_strided_slice %207 {offsets = [0, 0], sizes = [8, 51], strides = [1, 1]} : vector<8x256xf32> to vector<8x51xf32>
    %210 = tpu.concatenate %208, %209 in 1 : vector<8x205xf32>, vector<8x51xf32> -> vector<8x256xf32>
    %211 = vector.extract_strided_slice %3 {offsets = [26, 0], sizes = [1, 256], strides = [1, 1]} : vector<27x256xf32> to vector<1x256xf32>
    %212 = vector.broadcast %211 : vector<1x256xf32> to vector<8x256xf32>
    %213 = arith.mulf %210, %212 : vector<8x256xf32>
    %214 = arith.addf %206, %213 : vector<8x256xf32>
    %cst_11 = arith.constant 0.000000e+00 : f32
    %215 = vector.broadcast %cst_11 : f32 to vector<8x256xf32>
    %216 = arith.maximumf %214, %215 : vector<8x256xf32>
    %cst_12 = arith.constant dense<0.000000e+00> : vector<16x256xf32>
    %217 = tpu.matmul %1, %216, %cst_12 {dimension_numbers = #tpu.dot_dimension_numbers<[1], [0], [0], [1], [0, 0, 1, 1], [], []>} : vector<16x8xf32>, vector<8x256xf32>, vector<16x256xf32> -> vector<16x256xf32>
    %218 = vector.broadcast %2 : vector<16x1xf32> to vector<16x256xf32>
    %219 = arith.addf %217, %218 : vector<16x256xf32>
    %c0_13 = arith.constant 0 : index
    %c0_14 = arith.constant 0 : index
    %c0_15 = arith.constant 0 : index
    %220 = vector.load %arg6[%c0_13, %c0_14, %c0_15] : memref<2x16x256xf32, #tpu.memory_space<vmem>>, vector<1x16x256xf32>
    %221 = vector.shape_cast %220 : vector<1x16x256xf32> to vector<16x256xf32>
    %222 = vector.shape_cast %219 : vector<16x256xf32> to vector<1x16x256xf32>
    tpu.vector_store %arg6[%c0_13, %c0_14, %c0_15], %222 {strides = array<i32>} : memref<2x16x256xf32, #tpu.memory_space<vmem>>, vector<1x16x256xf32>,
    %c1 = arith.constant 1 : index
    %c0_16 = arith.constant 0 : index
    %c0_17 = arith.constant 0 : index
    %223 = vector.load %arg1[%c1, %c0_16, %c0_17] : memref<2x16x256xf32, #tpu.memory_space<vmem>>, vector<1x16x256xf32>
    %224 = vector.shape_cast %223 : vector<1x16x256xf32> to vector<16x256xf32>
    %cst_18 = arith.constant dense<0.000000e+00> : vector<216x256xf32>
    %225 = tpu.matmul %0, %224, %cst_18 {dimension_numbers = #tpu.dot_dimension_numbers<[1], [0], [0], [1], [0, 0, 1, 1], [], []>} : vector<216x16xf32>, vector<16x256xf32>, vector<216x256xf32> -> vector<216x256xf32>
    %cst_19 = arith.constant 0.000000e+00 : f32
    %226 = vector.broadcast %cst_19 : f32 to vector<8x256xf32>
    %227 = vector.extract_strided_slice %225 {offsets = [0, 0], sizes = [8, 256], strides = [1, 1]} : vector<216x256xf32> to vector<8x256xf32>
    %228 = vector.extract_strided_slice %227 {offsets = [0, 239], sizes = [8, 17], strides = [1, 1]} : vector<8x256xf32> to vector<8x17xf32>
    %229 = vector.extract_strided_slice %227 {offsets = [0, 0], sizes = [8, 239], strides = [1, 1]} : vector<8x256xf32> to vector<8x239xf32>
    %230 = tpu.concatenate %228, %229 in 1 : vector<8x17xf32>, vector<8x239xf32> -> vector<8x256xf32>
    %231 = vector.extract_strided_slice %3 {offsets = [0, 0], sizes = [1, 256], strides = [1, 1]} : vector<27x256xf32> to vector<1x256xf32>
    %232 = vector.broadcast %231 : vector<1x256xf32> to vector<8x256xf32>
    %233 = arith.mulf %230, %232 : vector<8x256xf32>
    %234 = arith.addf %226, %233 : vector<8x256xf32>
    %235 = vector.extract_strided_slice %225 {offsets = [8, 0], sizes = [8, 256], strides = [1, 1]} : vector<216x256xf32> to vector<8x256xf32>
    %236 = vector.extract_strided_slice %235 {offsets = [0, 240], sizes = [8, 16], strides = [1, 1]} : vector<8x256xf32> to vector<8x16xf32>
    %237 = vector.extract_strided_slice %235 {offsets = [0, 0], sizes = [8, 240], strides = [1, 1]} : vector<8x256xf32> to vector<8x240xf32>
    %238 = tpu.concatenate %236, %237 in 1 : vector<8x16xf32>, vector<8x240xf32> -> vector<8x256xf32>
    %239 = vector.extract_strided_slice %3 {offsets = [1, 0], sizes = [1, 256], strides = [1, 1]} : vector<27x256xf32> to vector<1x256xf32>
    %240 = vector.broadcast %239 : vector<1x256xf32> to vector<8x256xf32>
    %241 = arith.mulf %238, %240 : vector<8x256xf32>
    %242 = arith.addf %234, %241 : vector<8x256xf32>
    %243 = vector.extract_strided_slice %225 {offsets = [16, 0], sizes = [8, 256], strides = [1, 1]} : vector<216x256xf32> to vector<8x256xf32>
    %244 = vector.extract_strided_slice %243 {offsets = [0, 241], sizes = [8, 15], strides = [1, 1]} : vector<8x256xf32> to vector<8x15xf32>
    %245 = vector.extract_strided_slice %243 {offsets = [0, 0], sizes = [8, 241], strides = [1, 1]} : vector<8x256xf32> to vector<8x241xf32>
    %246 = tpu.concatenate %244, %245 in 1 : vector<8x15xf32>, vector<8x241xf32> -> vector<8x256xf32>
    %247 = vector.extract_strided_slice %3 {offsets = [2, 0], sizes = [1, 256], strides = [1, 1]} : vector<27x256xf32> to vector<1x256xf32>
    %248 = vector.broadcast %247 : vector<1x256xf32> to vector<8x256xf32>
    %249 = arith.mulf %246, %248 : vector<8x256xf32>
    %250 = arith.addf %242, %249 : vector<8x256xf32>
    %251 = vector.extract_strided_slice %225 {offsets = [24, 0], sizes = [8, 256], strides = [1, 1]} : vector<216x256xf32> to vector<8x256xf32>
    %252 = vector.extract_strided_slice %251 {offsets = [0, 255], sizes = [8, 1], strides = [1, 1]} : vector<8x256xf32> to vector<8x1xf32>
    %253 = vector.extract_strided_slice %251 {offsets = [0, 0], sizes = [8, 255], strides = [1, 1]} : vector<8x256xf32> to vector<8x255xf32>
    %254 = tpu.concatenate %252, %253 in 1 : vector<8x1xf32>, vector<8x255xf32> -> vector<8x256xf32>
    %255 = vector.extract_strided_slice %3 {offsets = [3, 0], sizes = [1, 256], strides = [1, 1]} : vector<27x256xf32> to vector<1x256xf32>
    %256 = vector.broadcast %255 : vector<1x256xf32> to vector<8x256xf32>
    %257 = arith.mulf %254, %256 : vector<8x256xf32>
    %258 = arith.addf %250, %257 : vector<8x256xf32>
    %259 = vector.extract_strided_slice %225 {offsets = [32, 0], sizes = [8, 256], strides = [1, 1]} : vector<216x256xf32> to vector<8x256xf32>
    %260 = vector.extract_strided_slice %3 {offsets = [4, 0], sizes = [1, 256], strides = [1, 1]} : vector<27x256xf32> to vector<1x256xf32>
    %261 = vector.broadcast %260 : vector<1x256xf32> to vector<8x256xf32>
    %262 = arith.mulf %259, %261 : vector<8x256xf32>
    %263 = arith.addf %258, %262 : vector<8x256xf32>
    %264 = vector.extract_strided_slice %225 {offsets = [40, 0], sizes = [8, 256], strides = [1, 1]} : vector<216x256xf32> to vector<8x256xf32>
    %265 = vector.extract_strided_slice %264 {offsets = [0, 1], sizes = [8, 255], strides = [1, 1]} : vector<8x256xf32> to vector<8x255xf32>
    %266 = vector.extract_strided_slice %264 {offsets = [0, 0], sizes = [8, 1], strides = [1, 1]} : vector<8x256xf32> to vector<8x1xf32>
    %267 = tpu.concatenate %265, %266 in 1 : vector<8x255xf32>, vector<8x1xf32> -> vector<8x256xf32>
    %268 = vector.extract_strided_slice %3 {offsets = [5, 0], sizes = [1, 256], strides = [1, 1]} : vector<27x256xf32> to vector<1x256xf32>
    %269 = vector.broadcast %268 : vector<1x256xf32> to vector<8x256xf32>
    %270 = arith.mulf %267, %269 : vector<8x256xf32>
    %271 = arith.addf %263, %270 : vector<8x256xf32>
    %272 = vector.extract_strided_slice %225 {offsets = [48, 0], sizes = [8, 256], strides = [1, 1]} : vector<216x256xf32> to vector<8x256xf32>
    %273 = vector.extract_strided_slice %272 {offsets = [0, 15], sizes = [8, 241], strides = [1, 1]} : vector<8x256xf32> to vector<8x241xf32>
    %274 = vector.extract_strided_slice %272 {offsets = [0, 0], sizes = [8, 15], strides = [1, 1]} : vector<8x256xf32> to vector<8x15xf32>
    %275 = tpu.concatenate %273, %274 in 1 : vector<8x241xf32>, vector<8x15xf32> -> vector<8x256xf32>
    %276 = vector.extract_strided_slice %3 {offsets = [6, 0], sizes = [1, 256], strides = [1, 1]} : vector<27x256xf32> to vector<1x256xf32>
    %277 = vector.broadcast %276 : vector<1x256xf32> to vector<8x256xf32>
    %278 = arith.mulf %275, %277 : vector<8x256xf32>
    %279 = arith.addf %271, %278 : vector<8x256xf32>
    %280 = vector.extract_strided_slice %225 {offsets = [56, 0], sizes = [8, 256], strides = [1, 1]} : vector<216x256xf32> to vector<8x256xf32>
    %281 = vector.extract_strided_slice %280 {offsets = [0, 16], sizes = [8, 240], strides = [1, 1]} : vector<8x256xf32> to vector<8x240xf32>
    %282 = vector.extract_strided_slice %280 {offsets = [0, 0], sizes = [8, 16], strides = [1, 1]} : vector<8x256xf32> to vector<8x16xf32>
    %283 = tpu.concatenate %281, %282 in 1 : vector<8x240xf32>, vector<8x16xf32> -> vector<8x256xf32>
    %284 = vector.extract_strided_slice %3 {offsets = [7, 0], sizes = [1, 256], strides = [1, 1]} : vector<27x256xf32> to vector<1x256xf32>
    %285 = vector.broadcast %284 : vector<1x256xf32> to vector<8x256xf32>
    %286 = arith.mulf %283, %285 : vector<8x256xf32>
    %287 = arith.addf %279, %286 : vector<8x256xf32>
    %288 = vector.extract_strided_slice %225 {offsets = [64, 0], sizes = [8, 256], strides = [1, 1]} : vector<216x256xf32> to vector<8x256xf32>
    %289 = vector.extract_strided_slice %288 {offsets = [0, 17], sizes = [8, 239], strides = [1, 1]} : vector<8x256xf32> to vector<8x239xf32>
    %290 = vector.extract_strided_slice %288 {offsets = [0, 0], sizes = [8, 17], strides = [1, 1]} : vector<8x256xf32> to vector<8x17xf32>
    %291 = tpu.concatenate %289, %290 in 1 : vector<8x239xf32>, vector<8x17xf32> -> vector<8x256xf32>
    %292 = vector.extract_strided_slice %3 {offsets = [8, 0], sizes = [1, 256], strides = [1, 1]} : vector<27x256xf32> to vector<1x256xf32>
    %293 = vector.broadcast %292 : vector<1x256xf32> to vector<8x256xf32>
    %294 = arith.mulf %291, %293 : vector<8x256xf32>
    %295 = arith.addf %287, %294 : vector<8x256xf32>
    %296 = vector.extract_strided_slice %225 {offsets = [72, 0], sizes = [8, 256], strides = [1, 1]} : vector<216x256xf32> to vector<8x256xf32>
    %297 = vector.extract_strided_slice %296 {offsets = [0, 222], sizes = [8, 34], strides = [1, 1]} : vector<8x256xf32> to vector<8x34xf32>
    %298 = vector.extract_strided_slice %296 {offsets = [0, 0], sizes = [8, 222], strides = [1, 1]} : vector<8x256xf32> to vector<8x222xf32>
    %299 = tpu.concatenate %297, %298 in 1 : vector<8x34xf32>, vector<8x222xf32> -> vector<8x256xf32>
    %300 = vector.extract_strided_slice %3 {offsets = [9, 0], sizes = [1, 256], strides = [1, 1]} : vector<27x256xf32> to vector<1x256xf32>
    %301 = vector.broadcast %300 : vector<1x256xf32> to vector<8x256xf32>
    %302 = arith.mulf %299, %301 : vector<8x256xf32>
    %303 = arith.addf %295, %302 : vector<8x256xf32>
    %304 = vector.extract_strided_slice %225 {offsets = [80, 0], sizes = [8, 256], strides = [1, 1]} : vector<216x256xf32> to vector<8x256xf32>
    %305 = vector.extract_strided_slice %304 {offsets = [0, 224], sizes = [8, 32], strides = [1, 1]} : vector<8x256xf32> to vector<8x32xf32>
    %306 = vector.extract_strided_slice %304 {offsets = [0, 0], sizes = [8, 224], strides = [1, 1]} : vector<8x256xf32> to vector<8x224xf32>
    %307 = tpu.concatenate %305, %306 in 1 : vector<8x32xf32>, vector<8x224xf32> -> vector<8x256xf32>
    %308 = vector.extract_strided_slice %3 {offsets = [10, 0], sizes = [1, 256], strides = [1, 1]} : vector<27x256xf32> to vector<1x256xf32>
    %309 = vector.broadcast %308 : vector<1x256xf32> to vector<8x256xf32>
    %310 = arith.mulf %307, %309 : vector<8x256xf32>
    %311 = arith.addf %303, %310 : vector<8x256xf32>
    %312 = vector.extract_strided_slice %225 {offsets = [88, 0], sizes = [8, 256], strides = [1, 1]} : vector<216x256xf32> to vector<8x256xf32>
    %313 = vector.extract_strided_slice %312 {offsets = [0, 226], sizes = [8, 30], strides = [1, 1]} : vector<8x256xf32> to vector<8x30xf32>
    %314 = vector.extract_strided_slice %312 {offsets = [0, 0], sizes = [8, 226], strides = [1, 1]} : vector<8x256xf32> to vector<8x226xf32>
    %315 = tpu.concatenate %313, %314 in 1 : vector<8x30xf32>, vector<8x226xf32> -> vector<8x256xf32>
    %316 = vector.extract_strided_slice %3 {offsets = [11, 0], sizes = [1, 256], strides = [1, 1]} : vector<27x256xf32> to vector<1x256xf32>
    %317 = vector.broadcast %316 : vector<1x256xf32> to vector<8x256xf32>
    %318 = arith.mulf %315, %317 : vector<8x256xf32>
    %319 = arith.addf %311, %318 : vector<8x256xf32>
    %320 = vector.extract_strided_slice %225 {offsets = [96, 0], sizes = [8, 256], strides = [1, 1]} : vector<216x256xf32> to vector<8x256xf32>
    %321 = vector.extract_strided_slice %320 {offsets = [0, 254], sizes = [8, 2], strides = [1, 1]} : vector<8x256xf32> to vector<8x2xf32>
    %322 = vector.extract_strided_slice %320 {offsets = [0, 0], sizes = [8, 254], strides = [1, 1]} : vector<8x256xf32> to vector<8x254xf32>
    %323 = tpu.concatenate %321, %322 in 1 : vector<8x2xf32>, vector<8x254xf32> -> vector<8x256xf32>
    %324 = vector.extract_strided_slice %3 {offsets = [12, 0], sizes = [1, 256], strides = [1, 1]} : vector<27x256xf32> to vector<1x256xf32>
    %325 = vector.broadcast %324 : vector<1x256xf32> to vector<8x256xf32>
    %326 = arith.mulf %323, %325 : vector<8x256xf32>
    %327 = arith.addf %319, %326 : vector<8x256xf32>
    %328 = vector.extract_strided_slice %225 {offsets = [104, 0], sizes = [8, 256], strides = [1, 1]} : vector<216x256xf32> to vector<8x256xf32>
    %329 = vector.extract_strided_slice %3 {offsets = [13, 0], sizes = [1, 256], strides = [1, 1]} : vector<27x256xf32> to vector<1x256xf32>
    %330 = vector.broadcast %329 : vector<1x256xf32> to vector<8x256xf32>
    %331 = arith.mulf %328, %330 : vector<8x256xf32>
    %332 = arith.addf %327, %331 : vector<8x256xf32>
    %333 = vector.extract_strided_slice %225 {offsets = [112, 0], sizes = [8, 256], strides = [1, 1]} : vector<216x256xf32> to vector<8x256xf32>
    %334 = vector.extract_strided_slice %333 {offsets = [0, 2], sizes = [8, 254], strides = [1, 1]} : vector<8x256xf32> to vector<8x254xf32>
    %335 = vector.extract_strided_slice %333 {offsets = [0, 0], sizes = [8, 2], strides = [1, 1]} : vector<8x256xf32> to vector<8x2xf32>
    %336 = tpu.concatenate %334, %335 in 1 : vector<8x254xf32>, vector<8x2xf32> -> vector<8x256xf32>
    %337 = vector.extract_strided_slice %3 {offsets = [14, 0], sizes = [1, 256], strides = [1, 1]} : vector<27x256xf32> to vector<1x256xf32>
    %338 = vector.broadcast %337 : vector<1x256xf32> to vector<8x256xf32>
    %339 = arith.mulf %336, %338 : vector<8x256xf32>
    %340 = arith.addf %332, %339 : vector<8x256xf32>
    %341 = vector.extract_strided_slice %225 {offsets = [120, 0], sizes = [8, 256], strides = [1, 1]} : vector<216x256xf32> to vector<8x256xf32>
    %342 = vector.extract_strided_slice %341 {offsets = [0, 30], sizes = [8, 226], strides = [1, 1]} : vector<8x256xf32> to vector<8x226xf32>
    %343 = vector.extract_strided_slice %341 {offsets = [0, 0], sizes = [8, 30], strides = [1, 1]} : vector<8x256xf32> to vector<8x30xf32>
    %344 = tpu.concatenate %342, %343 in 1 : vector<8x226xf32>, vector<8x30xf32> -> vector<8x256xf32>
    %345 = vector.extract_strided_slice %3 {offsets = [15, 0], sizes = [1, 256], strides = [1, 1]} : vector<27x256xf32> to vector<1x256xf32>
    %346 = vector.broadcast %345 : vector<1x256xf32> to vector<8x256xf32>
    %347 = arith.mulf %344, %346 : vector<8x256xf32>
    %348 = arith.addf %340, %347 : vector<8x256xf32>
    %349 = vector.extract_strided_slice %225 {offsets = [128, 0], sizes = [8, 256], strides = [1, 1]} : vector<216x256xf32> to vector<8x256xf32>
    %350 = vector.extract_strided_slice %349 {offsets = [0, 32], sizes = [8, 224], strides = [1, 1]} : vector<8x256xf32> to vector<8x224xf32>
    %351 = vector.extract_strided_slice %349 {offsets = [0, 0], sizes = [8, 32], strides = [1, 1]} : vector<8x256xf32> to vector<8x32xf32>
    %352 = tpu.concatenate %350, %351 in 1 : vector<8x224xf32>, vector<8x32xf32> -> vector<8x256xf32>
    %353 = vector.extract_strided_slice %3 {offsets = [16, 0], sizes = [1, 256], strides = [1, 1]} : vector<27x256xf32> to vector<1x256xf32>
    %354 = vector.broadcast %353 : vector<1x256xf32> to vector<8x256xf32>
    %355 = arith.mulf %352, %354 : vector<8x256xf32>
    %356 = arith.addf %348, %355 : vector<8x256xf32>
    %357 = vector.extract_strided_slice %225 {offsets = [136, 0], sizes = [8, 256], strides = [1, 1]} : vector<216x256xf32> to vector<8x256xf32>
    %358 = vector.extract_strided_slice %357 {offsets = [0, 34], sizes = [8, 222], strides = [1, 1]} : vector<8x256xf32> to vector<8x222xf32>
    %359 = vector.extract_strided_slice %357 {offsets = [0, 0], sizes = [8, 34], strides = [1, 1]} : vector<8x256xf32> to vector<8x34xf32>
    %360 = tpu.concatenate %358, %359 in 1 : vector<8x222xf32>, vector<8x34xf32> -> vector<8x256xf32>
    %361 = vector.extract_strided_slice %3 {offsets = [17, 0], sizes = [1, 256], strides = [1, 1]} : vector<27x256xf32> to vector<1x256xf32>
    %362 = vector.broadcast %361 : vector<1x256xf32> to vector<8x256xf32>
    %363 = arith.mulf %360, %362 : vector<8x256xf32>
    %364 = arith.addf %356, %363 : vector<8x256xf32>
    %365 = vector.extract_strided_slice %225 {offsets = [144, 0], sizes = [8, 256], strides = [1, 1]} : vector<216x256xf32> to vector<8x256xf32>
    %366 = vector.extract_strided_slice %365 {offsets = [0, 205], sizes = [8, 51], strides = [1, 1]} : vector<8x256xf32> to vector<8x51xf32>
    %367 = vector.extract_strided_slice %365 {offsets = [0, 0], sizes = [8, 205], strides = [1, 1]} : vector<8x256xf32> to vector<8x205xf32>
    %368 = tpu.concatenate %366, %367 in 1 : vector<8x51xf32>, vector<8x205xf32> -> vector<8x256xf32>
    %369 = vector.extract_strided_slice %3 {offsets = [18, 0], sizes = [1, 256], strides = [1, 1]} : vector<27x256xf32> to vector<1x256xf32>
    %370 = vector.broadcast %369 : vector<1x256xf32> to vector<8x256xf32>
    %371 = arith.mulf %368, %370 : vector<8x256xf32>
    %372 = arith.addf %364, %371 : vector<8x256xf32>
    %373 = vector.extract_strided_slice %225 {offsets = [152, 0], sizes = [8, 256], strides = [1, 1]} : vector<216x256xf32> to vector<8x256xf32>
    %374 = vector.extract_strided_slice %373 {offsets = [0, 208], sizes = [8, 48], strides = [1, 1]} : vector<8x256xf32> to vector<8x48xf32>
    %375 = vector.extract_strided_slice %373 {offsets = [0, 0], sizes = [8, 208], strides = [1, 1]} : vector<8x256xf32> to vector<8x208xf32>
    %376 = tpu.concatenate %374, %375 in 1 : vector<8x48xf32>, vector<8x208xf32> -> vector<8x256xf32>
    %377 = vector.extract_strided_slice %3 {offsets = [19, 0], sizes = [1, 256], strides = [1, 1]} : vector<27x256xf32> to vector<1x256xf32>
    %378 = vector.broadcast %377 : vector<1x256xf32> to vector<8x256xf32>
    %379 = arith.mulf %376, %378 : vector<8x256xf32>
    %380 = arith.addf %372, %379 : vector<8x256xf32>
    %381 = vector.extract_strided_slice %225 {offsets = [160, 0], sizes = [8, 256], strides = [1, 1]} : vector<216x256xf32> to vector<8x256xf32>
    %382 = vector.extract_strided_slice %381 {offsets = [0, 211], sizes = [8, 45], strides = [1, 1]} : vector<8x256xf32> to vector<8x45xf32>
    %383 = vector.extract_strided_slice %381 {offsets = [0, 0], sizes = [8, 211], strides = [1, 1]} : vector<8x256xf32> to vector<8x211xf32>
    %384 = tpu.concatenate %382, %383 in 1 : vector<8x45xf32>, vector<8x211xf32> -> vector<8x256xf32>
    %385 = vector.extract_strided_slice %3 {offsets = [20, 0], sizes = [1, 256], strides = [1, 1]} : vector<27x256xf32> to vector<1x256xf32>
    %386 = vector.broadcast %385 : vector<1x256xf32> to vector<8x256xf32>
    %387 = arith.mulf %384, %386 : vector<8x256xf32>
    %388 = arith.addf %380, %387 : vector<8x256xf32>
    %389 = vector.extract_strided_slice %225 {offsets = [168, 0], sizes = [8, 256], strides = [1, 1]} : vector<216x256xf32> to vector<8x256xf32>
    %390 = vector.extract_strided_slice %389 {offsets = [0, 253], sizes = [8, 3], strides = [1, 1]} : vector<8x256xf32> to vector<8x3xf32>
    %391 = vector.extract_strided_slice %389 {offsets = [0, 0], sizes = [8, 253], strides = [1, 1]} : vector<8x256xf32> to vector<8x253xf32>
    %392 = tpu.concatenate %390, %391 in 1 : vector<8x3xf32>, vector<8x253xf32> -> vector<8x256xf32>
    %393 = vector.extract_strided_slice %3 {offsets = [21, 0], sizes = [1, 256], strides = [1, 1]} : vector<27x256xf32> to vector<1x256xf32>
    %394 = vector.broadcast %393 : vector<1x256xf32> to vector<8x256xf32>
    %395 = arith.mulf %392, %394 : vector<8x256xf32>
    %396 = arith.addf %388, %395 : vector<8x256xf32>
    %397 = vector.extract_strided_slice %225 {offsets = [176, 0], sizes = [8, 256], strides = [1, 1]} : vector<216x256xf32> to vector<8x256xf32>
    %398 = vector.extract_strided_slice %3 {offsets = [22, 0], sizes = [1, 256], strides = [1, 1]} : vector<27x256xf32> to vector<1x256xf32>
    %399 = vector.broadcast %398 : vector<1x256xf32> to vector<8x256xf32>
    %400 = arith.mulf %397, %399 : vector<8x256xf32>
    %401 = arith.addf %396, %400 : vector<8x256xf32>
    %402 = vector.extract_strided_slice %225 {offsets = [184, 0], sizes = [8, 256], strides = [1, 1]} : vector<216x256xf32> to vector<8x256xf32>
    %403 = vector.extract_strided_slice %402 {offsets = [0, 3], sizes = [8, 253], strides = [1, 1]} : vector<8x256xf32> to vector<8x253xf32>
    %404 = vector.extract_strided_slice %402 {offsets = [0, 0], sizes = [8, 3], strides = [1, 1]} : vector<8x256xf32> to vector<8x3xf32>
    %405 = tpu.concatenate %403, %404 in 1 : vector<8x253xf32>, vector<8x3xf32> -> vector<8x256xf32>
    %406 = vector.extract_strided_slice %3 {offsets = [23, 0], sizes = [1, 256], strides = [1, 1]} : vector<27x256xf32> to vector<1x256xf32>
    %407 = vector.broadcast %406 : vector<1x256xf32> to vector<8x256xf32>
    %408 = arith.mulf %405, %407 : vector<8x256xf32>
    %409 = arith.addf %401, %408 : vector<8x256xf32>
    %410 = vector.extract_strided_slice %225 {offsets = [192, 0], sizes = [8, 256], strides = [1, 1]} : vector<216x256xf32> to vector<8x256xf32>
    %411 = vector.extract_strided_slice %410 {offsets = [0, 45], sizes = [8, 211], strides = [1, 1]} : vector<8x256xf32> to vector<8x211xf32>
    %412 = vector.extract_strided_slice %410 {offsets = [0, 0], sizes = [8, 45], strides = [1, 1]} : vector<8x256xf32> to vector<8x45xf32>
    %413 = tpu.concatenate %411, %412 in 1 : vector<8x211xf32>, vector<8x45xf32> -> vector<8x256xf32>
    %414 = vector.extract_strided_slice %3 {offsets = [24, 0], sizes = [1, 256], strides = [1, 1]} : vector<27x256xf32> to vector<1x256xf32>
    %415 = vector.broadcast %414 : vector<1x256xf32> to vector<8x256xf32>
    %416 = arith.mulf %413, %415 : vector<8x256xf32>
    %417 = arith.addf %409, %416 : vector<8x256xf32>
    %418 = vector.extract_strided_slice %225 {offsets = [200, 0], sizes = [8, 256], strides = [1, 1]} : vector<216x256xf32> to vector<8x256xf32>
    %419 = vector.extract_strided_slice %418 {offsets = [0, 48], sizes = [8, 208], strides = [1, 1]} : vector<8x256xf32> to vector<8x208xf32>
    %420 = vector.extract_strided_slice %418 {offsets = [0, 0], sizes = [8, 48], strides = [1, 1]} : vector<8x256xf32> to vector<8x48xf32>
    %421 = tpu.concatenate %419, %420 in 1 : vector<8x208xf32>, vector<8x48xf32> -> vector<8x256xf32>
    %422 = vector.extract_strided_slice %3 {offsets = [25, 0], sizes = [1, 256], strides = [1, 1]} : vector<27x256xf32> to vector<1x256xf32>
    %423 = vector.broadcast %422 : vector<1x256xf32> to vector<8x256xf32>
    %424 = arith.mulf %421, %423 : vector<8x256xf32>
    %425 = arith.addf %417, %424 : vector<8x256xf32>
    %426 = vector.extract_strided_slice %225 {offsets = [208, 0], sizes = [8, 256], strides = [1, 1]} : vector<216x256xf32> to vector<8x256xf32>
    %427 = vector.extract_strided_slice %426 {offsets = [0, 51], sizes = [8, 205], strides = [1, 1]} : vector<8x256xf32> to vector<8x205xf32>
    %428 = vector.extract_strided_slice %426 {offsets = [0, 0], sizes = [8, 51], strides = [1, 1]} : vector<8x256xf32> to vector<8x51xf32>
    %429 = tpu.concatenate %427, %428 in 1 : vector<8x205xf32>, vector<8x51xf32> -> vector<8x256xf32>
    %430 = vector.extract_strided_slice %3 {offsets = [26, 0], sizes = [1, 256], strides = [1, 1]} : vector<27x256xf32> to vector<1x256xf32>
    %431 = vector.broadcast %430 : vector<1x256xf32> to vector<8x256xf32>
    %432 = arith.mulf %429, %431 : vector<8x256xf32>
    %433 = arith.addf %425, %432 : vector<8x256xf32>
    %cst_20 = arith.constant 0.000000e+00 : f32
    %434 = vector.broadcast %cst_20 : f32 to vector<8x256xf32>
    %435 = arith.maximumf %433, %434 : vector<8x256xf32>
    %cst_21 = arith.constant dense<0.000000e+00> : vector<16x256xf32>
    %436 = tpu.matmul %1, %435, %cst_21 {dimension_numbers = #tpu.dot_dimension_numbers<[1], [0], [0], [1], [0, 0, 1, 1], [], []>} : vector<16x8xf32>, vector<8x256xf32>, vector<16x256xf32> -> vector<16x256xf32>
    %437 = vector.broadcast %2 : vector<16x1xf32> to vector<16x256xf32>
    %438 = arith.addf %436, %437 : vector<16x256xf32>
    %c1_22 = arith.constant 1 : index
    %c0_23 = arith.constant 0 : index
    %c0_24 = arith.constant 0 : index
    %439 = vector.load %arg6[%c1_22, %c0_23, %c0_24] : memref<2x16x256xf32, #tpu.memory_space<vmem>>, vector<1x16x256xf32>
    %440 = vector.shape_cast %439 : vector<1x16x256xf32> to vector<16x256xf32>
    %441 = vector.shape_cast %438 : vector<16x256xf32> to vector<1x16x256xf32>
    tpu.vector_store %arg6[%c1_22, %c0_23, %c0_24], %441 {strides = array<i32>} : memref<2x16x256xf32, #tpu.memory_space<vmem>>, vector<1x16x256xf32>,
    return
  }
  func.func @transform_0(%arg0: i32) -> (i32, i32, i32) {
    %c0_i32 = arith.constant 0 : i32
    %c0_i32_0 = arith.constant 0 : i32
    %c0_i32_1 = arith.constant 0 : i32
    return %arg0, %c0_i32, %c0_i32_0 : i32, i32, i32
  }
  func.func @transform_1(%arg0: i32) -> (i32, i32) {
    %c0_i32 = arith.constant 0 : i32
    %c0_i32_0 = arith.constant 0 : i32
    %c0_i32_1 = arith.constant 0 : i32
    return %c0_i32, %c0_i32_0 : i32, i32
  }
  func.func @transform_2(%arg0: i32) -> (i32, i32) {
    %c0_i32 = arith.constant 0 : i32
    %c0_i32_0 = arith.constant 0 : i32
    %c0_i32_1 = arith.constant 0 : i32
    return %c0_i32, %c0_i32_0 : i32, i32
  }
  func.func @transform_3(%arg0: i32) -> (i32, i32) {
    %c0_i32 = arith.constant 0 : i32
    %c0_i32_0 = arith.constant 0 : i32
    %c0_i32_1 = arith.constant 0 : i32
    return %c0_i32, %c0_i32_0 : i32, i32
  }
  func.func @transform_4(%arg0: i32) -> (i32, i32) {
    %c0_i32 = arith.constant 0 : i32
    %c0_i32_0 = arith.constant 0 : i32
    %c0_i32_1 = arith.constant 0 : i32
    return %c0_i32, %c0_i32_0 : i32, i32
  }
  func.func @transform_5(%arg0: i32) -> (i32, i32, i32) {
    %c0_i32 = arith.constant 0 : i32
    %c0_i32_0 = arith.constant 0 : i32
    %c0_i32_1 = arith.constant 0 : i32
    return %arg0, %c0_i32, %c0_i32_0 : i32, i32, i32
  }
}

</mosaic_0001>

<bundles_post_ra>
// kernel: dee_forward.1
= control target key start
LH: loop header
LB: loop body
LE: loop exit
PB: predicated region body
PF: predicated region fallthrough
CT: control target
= control target key end

     0   :  { %v2900_v3 = vmov 0.0   ;;  %vm63_vm0 = vcmask 130048   ;;  %s1884_s30 = smov 17   ;;  %s1885_s6 = smov 16   ;;  %vm379_vm1 = vcmask 138240   ;;  %vm426_vm2 = vcmask 121856   ;;  %s2888_s0 = inlined_call_operand.vmem [shape: f32[2,16,256], index: 0, kind: input, shape index: {}]   ;;  %s2889_s1 = inlined_call_operand.vmem [shape: f32[216,16], index: 1, kind: input, shape index: {}]   ;;  %s2890_s4 = inlined_call_operand.vmem [shape: f32[27,256], index: 4, kind: input, shape index: {}]   ;;  %s2891_s2 = inlined_call_operand.vmem [shape: f32[16,8], index: 2, kind: input, shape index: {}]   ;;  %s2892_s3 = inlined_call_operand.vmem [shape: f32[16,1], index: 3, kind: input, shape index: {}]   ;;  %s2893_s5 = inlined_call_operand.vmem [shape: f32[2,16,256], index: 5, kind: output, shape index: {}]  }
   0x1   :  { %v62_v0 = vld [vmem:[%s2888_s0 + $0x18] sm:$0xff]  ;;  %v61_v1 = vld [vmem:[%s2888_s0 + $0x10] sm:$0xff]  ;;  %v60_v2 = vld [vmem:[%s2888_s0 + $0x8] sm:$0xff]  ;;  %209 = vmatprep.mubr.f32.mxu0 %v2900_v3  ;;  %1066 = vmatprep.mubr.f32.mxu1 %v2900_v3  ;;  %s1886_s7 = smov 15   ;;  %s1887_s8 = smov 1   ;;  %vm450_vm3 = vcmask 7168  }
   0x2   :  { %173 = vmatprep.subr.mxu0 %v62_v0  ;;  %v59_v4 = vld [vmem:[%s2888_s0] sm:$0xff]  ;;  %v21_v6 = vld [vmem:[%s2889_s1 + $0x8] sm:$0xff]  ;;  %v22_v7 = vld [vmem:[%s2889_s1 + $0x10] sm:$0xff]  ;;  %s1888_s9 = smov 127   ;;  %s1889_s10 = smov 113   ;;  %vm485_vm4 = vcmask 1039360  }
   0x3   :  { %174 = vmatpush1.msra.mxu0 %v61_v1  ;;  %v20_v5 = vld [vmem:[%s2889_s1] sm:$0xff]  ;;  %v23_v8 = vld [vmem:[%s2889_s1 + $0x18] sm:$0xff]  ;;  %v25_v10 = vld [vmem:[%s2889_s1 + $0x28] sm:$0xff]  ;;  %s1890_s11 = smov 112   ;;  %s1891_s12 = smov 111   ;;  %vm509_vm5 = vcmask 924672  }
   0x4   :  { %175 = vmatprep.subr.mxu0 %v60_v2  ;;  %v24_v9 = vld [vmem:[%s2889_s1 + $0x20] sm:$0xff]  ;;  %v26_v11 = vld [vmem:[%s2889_s1 + $0x30] sm:$0xff]  ;;  %v27_v12 = vld [vmem:[%s2889_s1 + $0x38] sm:$0xff]  ;;  %s1892_s13 = smov 34   ;;  %s1893_s14 = smov 32   ;;  %vm533_vm6 = vcmask 916480  }
   0x5   :  { %176 = vmatpush1.msra.mxu0 %v59_v4  ;;  %v28_v13 = vld [vmem:[%s2889_s1 + $0x40] sm:$0xff]  ;;  %v29_v14 = vld [vmem:[%s2889_s1 + $0x48] sm:$0xff]  ;;  %v30_v15 = vld [vmem:[%s2889_s1 + $0x50] sm:$0xff]  ;;  %s1894_s15 = smov 30   ;;  %s1895_s16 = smov 2   ;;  %vm557_vm7 = vcmask 908288  }
   0x6   :  { %1775 = vmatmul.mubr.msk.f32.vlgmr.msra.gmra.mxu0 %vm63_vm0, %v20_v5  ;;  %v31_v16 = vld [vmem:[%s2889_s1 + $0x58] sm:$0xff]  ;;  %v32_v17 = vld [vmem:[%s2889_s1 + $0x60] sm:$0xff]  ;;  %v33_v18 = vld [vmem:[%s2889_s1 + $0x68] sm:$0xff]  ;;  %s1896_s17 = smov 126   ;;  %s1897_s18 = smov 98   ;;  %vm582_vm8 = vcmask 277504  }
   0x7   :  { %215 = vmatprep.mubr.f32.mxu0 %v2900_v3  ;;  %v2026_v19 = vld [vmem:[%s2889_s1 + $0x70] sm:$0xff]  ;;  %v2034_v20 = vld [vmem:[%s2889_s1 + $0x78] sm:$0xff]  ;;  %v2042_v21 = vld [vmem:[%s2889_s1 + $0x80] sm:$0xff]  ;;  %s1898_s19 = smov 96   ;;  %s1899_s20 = smov 94   ;;  %vm606_vm9 = vcmask 261120  }
   0x8   :  { %v2050_v22 = vld [vmem:[%s2889_s1 + $0x88] sm:$0xff]  ;;  %v2058_v23 = vld [vmem:[%s2889_s1 + $0x90] sm:$0xff]  ;;  %v2066_v24 = vld [vmem:[%s2889_s1 + $0x98] sm:$0xff]  ;;  %s1900_s21 = smov 51   ;;  %s1901_s22 = smov 48   ;;  %vm630_vm10 = vcmask 244736  }
   0x9   :  { %v2074_v25 = vld [vmem:[%s2889_s1 + $0xa0] sm:$0xff]  ;;  %v2082_v26 = vld [vmem:[%s2889_s1 + $0xa8] sm:$0xff]  ;;  %v2090_v27 = vld [vmem:[%s2889_s1 + $0xb0] sm:$0xff]  ;;  %s2940_s23 = smov 45   ;;  %s2938_s24 = smov 3   ;;  %vm654_vm11 = vcmask 15360  }
   0xa   :  { %1776 = vmatmul.mubr.msk.f32.gmra.mxu0 %vm63_vm0, %v21_v6  ;;  %v2098_v28 = vld [vmem:[%s2889_s1 + $0xb8] sm:$0xff]  ;;  %v2106_v29 = vld [vmem:[%s2889_s1 + $0xc0] sm:$0xff]  ;;  %v2114_v30 = vld [vmem:[%s2889_s1 + $0xc8] sm:$0xff]  ;;  %s2936_s25 = smov 125   ;;  %s2898_s26 = smov 83   ;;  %vm689_vm12 = vcmask 1031168  }
   0xb   :  { %221 = vmatprep.mubr.f32.mxu0 %v2900_v3  ;;  %v2122_v31 = vld [vmem:[%s2889_s1 + $0xd0] sm:$0xff]  ;;  %s2894_s27 = smov 80   ;;  %s2896_s28 = smov 77   ;;  %vm2914_vm13 = vcmask 801792   ;;  %vm2918_vm14 = vcmask 785408   ;;  %vm2925_vm15 = vcmask 769024  }
   0xe   :  { %1777 = vmatmul.mubr.msk.f32.gmra.mxu0 %vm63_vm0, %v22_v7 }
   0xf   :  { %227 = vmatprep.mubr.f32.mxu0 %v2900_v3 }
  0x12   :  { %1778 = vmatmul.mubr.msk.f32.gmra.mxu0 %vm63_vm0, %v23_v8 }
  0x13   :  { %233 = vmatprep.mubr.f32.mxu0 %v2900_v3 }
  0x16   :  { %1779 = vmatmul.mubr.msk.f32.gmra.mxu0 %vm63_vm0, %v24_v9 }
  0x17   :  { %239 = vmatprep.mubr.f32.mxu0 %v2900_v3 }
  0x1a   :  { %1780 = vmatmul.mubr.msk.f32.gmra.mxu0 %vm63_vm0, %v25_v10 }
  0x1b   :  { %245 = vmatprep.mubr.f32.mxu0 %v2900_v3 }
  0x1e   :  { %1781 = vmatmul.mubr.msk.f32.gmra.mxu0 %vm63_vm0, %v26_v11 }
  0x1f   :  { %251 = vmatprep.mubr.f32.mxu0 %v2900_v3 }
  0x22   :  { %1782 = vmatmul.mubr.msk.f32.gmra.mxu0 %vm63_vm0, %v27_v12 }
  0x23   :  { %257 = vmatprep.mubr.f32.mxu0 %v2900_v3 }
  0x26   :  { %1783 = vmatmul.mubr.msk.f32.gmra.mxu0 %vm63_vm0, %v28_v13 }
  0x27   :  { %263 = vmatprep.mubr.f32.mxu0 %v2900_v3 }
  0x2a   :  { %1784 = vmatmul.mubr.msk.f32.gmra.mxu0 %vm63_vm0, %v29_v14 }
  0x2b   :  { %269 = vmatprep.mubr.f32.mxu0 %v2900_v3 }
  0x2e   :  { %1785 = vmatmul.mubr.msk.f32.gmra.mxu0 %vm63_vm0, %v30_v15 }
  0x2f   :  { %275 = vmatprep.mubr.f32.mxu0 %v2900_v3 }
  0x32   :  { %1786 = vmatmul.mubr.msk.f32.gmra.mxu0 %vm63_vm0, %v31_v16 }
  0x33   :  { %281 = vmatprep.mubr.f32.mxu0 %v2900_v3 }
  0x36   :  { %1787 = vmatmul.mubr.msk.f32.gmra.mxu0 %vm63_vm0, %v32_v17 }
  0x37   :  { %287 = vmatprep.mubr.f32.mxu0 %v2900_v3 }
  0x3a   :  { %1788 = vmatmul.mubr.msk.f32.gmra.mxu0 %vm63_vm0, %v33_v18 }
  0x3b   :  { %293 = vmatprep.mubr.f32.mxu0 %v2900_v3 }
  0x3e   :  { %1789 = vmatmul.mubr.msk.f32.gmra.mxu0 %vm63_vm0, %v2026_v19 }
  0x3f   :  { %299 = vmatprep.mubr.f32.mxu0 %v2900_v3 }
  0x42   :  { %1790 = vmatmul.mubr.msk.f32.gmra.mxu0 %vm63_vm0, %v2034_v20 }
  0x43   :  { %305 = vmatprep.mubr.f32.mxu0 %v2900_v3 }
  0x46   :  { %1791 = vmatmul.mubr.msk.f32.gmra.mxu0 %vm63_vm0, %v2042_v21 }
  0x47   :  { %311 = vmatprep.mubr.f32.mxu0 %v2900_v3 }
  0x4a   :  { %1792 = vmatmul.mubr.msk.f32.gmra.mxu0 %vm63_vm0, %v2050_v22 }
  0x4b   :  { %317 = vmatprep.mubr.f32.mxu0 %v2900_v3 }
  0x4e   :  { %1793 = vmatmul.mubr.msk.f32.gmra.mxu0 %vm63_vm0, %v2058_v23 }
  0x4f   :  { %323 = vmatprep.mubr.f32.mxu0 %v2900_v3 }
  0x52   :  { %1794 = vmatmul.mubr.msk.f32.gmra.mxu0 %vm63_vm0, %v2066_v24 }
  0x53   :  { %329 = vmatprep.mubr.f32.mxu0 %v2900_v3 }
  0x56   :  { %1795 = vmatmul.mubr.msk.f32.gmra.mxu0 %vm63_vm0, %v2074_v25 }
  0x57   :  { %335 = vmatprep.mubr.f32.mxu0 %v2900_v3 }
  0x5a   :  { %1796 = vmatmul.mubr.msk.f32.gmra.mxu0 %vm63_vm0, %v2082_v26 }
  0x5b   :  { %341 = vmatprep.mubr.f32.mxu0 %v2900_v3 }
  0x5e   :  { %1797 = vmatmul.mubr.msk.f32.gmra.mxu0 %vm63_vm0, %v2090_v27 }
  0x5f   :  { %347 = vmatprep.mubr.f32.mxu0 %v2900_v3 }
  0x62   :  { %1798 = vmatmul.mubr.msk.f32.gmra.mxu0 %vm63_vm0, %v2098_v28 }
  0x63   :  { %353 = vmatprep.mubr.f32.mxu0 %v2900_v3 }
  0x66   :  { %1799 = vmatmul.mubr.msk.f32.gmra.mxu0 %vm63_vm0, %v2106_v29 }
  0x67   :  { %359 = vmatprep.mubr.f32.mxu0 %v2900_v3 }
  0x6a   :  { %1800 = vmatmul.mubr.msk.f32.gmra.mxu0 %vm63_vm0, %v2114_v30 }
  0x6b   :  { %365 = vmatprep.mubr.f32.mxu0 %v2900_v3 }
  0x6e   :  { %1801 = vmatmul.mubr.msk.f32.gmra.mxu0 %vm63_vm0, %v2122_v31 }
  0x6f   :  { %1753 = vmatprep.mubr.f32.mxu0 %v2900_v3 }
  0xc6   :  { %v211_v32 = vpop.f32.mrf.mxu0 }
  0xc7   :  { %377 = vrot.lane.b32.xlu0 %v211_v32, %s1884_s30 }
  0xc8   :  { %v213_v33 = vpop.f32.mrf.mxu0 }
  0xca   :  { %v217_v34 = vpop.f32.mrf.mxu0 }
  0xcb   :  { %373 = vrot.lane.b32.xlu0 %v213_v33, %s1884_s30  ;;  %401 = vrot.lane.b32.xlu1 %v217_v34, %s1885_s6 }
  0xcc   :  { %v219_v35 = vpop.f32.mrf.mxu0 }
  0xce   :  { %v223_v36 = vpop.f32.mrf.mxu0 }
  0xcf   :  { %397 = vrot.lane.b32.xlu1 %v219_v35, %s1885_s6 }
  0xd0   :  { %v225_v37 = vpop.f32.mrf.mxu0 }
  0xd1   :  { %420 = vrot.lane.b32.xlu0 %v225_v37, %s1886_s7 }
  0xd2   :  { %v229_v38 = vpop.f32.mrf.mxu0 }
  0xd3   :  { %424 = vrot.lane.b32.xlu1 %v223_v36, %s1886_s7 }
  0xd4   :  { %v231_v39 = vpop.f32.mrf.mxu0 }
  0xd5   :  { %444 = vrot.lane.b32.xlu0 %v231_v39, %s1887_s8 }
  0xd6   :  { %v2134_v40 = vpop.f32.mrf.mxu0 }
  0xd7   :  { %448 = vrot.lane.b32.xlu1 %v229_v38, %s1887_s8 }
  0xd8   :  { %v2137_v41 = vpop.f32.mrf.mxu0 }
  0xda   :  { %v241_v42 = vpop.f32.mrf.mxu0 }
  0xdb   :  { %481 = vrot.lane.b32.xlu0 %v241_v42, %s1888_s9 }
  0xdc   :  { %v243_v43 = vpop.f32.mrf.mxu0 }
  0xdd   :  { %483 = vrot.lane.b32.xlu1 %v243_v43, %s1888_s9  ;;  %v384_v43 = vlaneseq }
  0xde   :  { %v247_v44 = vpop.f32.mrf.mxu0 }
  0xdf   :  { %505 = vrot.lane.b32.xlu0 %v247_v44, %s1889_s10 }
  0xe0   :  { %v249_v45 = vpop.f32.mrf.mxu0 }
  0xe1   :  { %507 = vrot.lane.b32.xlu1 %v249_v45, %s1889_s10  ;;  %v385_v45 = vshrl.u32 %v384_v43, 7 }
  0xe2   :  { %v253_v46 = vpop.f32.mrf.mxu0 }
  0xe3   :  { %529 = vrot.lane.b32.xlu0 %v253_v46, %s1890_s11 }
  0xe4   :  { %v255_v47 = vpop.f32.mrf.mxu0 }
  0xe5   :  { %531 = vrot.lane.b32.xlu1 %v255_v47, %s1890_s11  ;;  %v2187_v47 = vsub.s32 1, %v385_v45 }
  0xe6   :  { %v259_v48 = vpop.f32.mrf.mxu0 }
  0xe7   :  { %553 = vrot.lane.b32.xlu0 %v259_v48, %s1891_s12 }
  0xe8   :  { %v261_v49 = vpop.f32.mrf.mxu0 }
  0xe9   :  { %555 = vrot.lane.b32.xlu1 %v261_v49, %s1891_s12  ;;  %v2189_v49 = vsub.s32 0, %v385_v45 }
  0xea   :  { %v265_v50 = vpop.f32.mrf.mxu0 }
  0xec   :  { %v267_v51 = vpop.f32.mrf.mxu0 }
  0xed   :  { %580 = vrot.lane.b32.xlu1 %v265_v50, %s1892_s13  ;;  %576 = vrot.lane.b32.xlu0 %v267_v51, %s1892_s13  ;;  %v2191_v50 = vsub.s32 2, %v385_v45 }
  0xee   :  { %v271_v52 = vpop.f32.mrf.mxu0 }
  0xf0   :  { %v273_v53 = vpop.f32.mrf.mxu0 }
  0xf1   :  { %604 = vrot.lane.b32.xlu1 %v271_v52, %s1893_s14  ;;  %600 = vrot.lane.b32.xlu0 %v273_v53, %s1893_s14  ;;  %v51_v52 = vld [vmem:[%s2890_s4] sm:$0xff]  ;;  %v52_v53 = vld [vmem:[%s2890_s4 + $0x8] sm:$0xff] }
  0xf2   :  { %v277_v54 = vpop.f32.mrf.mxu0 }
  0xf4   :  { %v279_v55 = vpop.f32.mrf.mxu0 }
  0xf5   :  { %628 = vrot.lane.b32.xlu1 %v277_v54, %s1894_s15  ;;  %624 = vrot.lane.b32.xlu0 %v279_v55, %s1894_s15  ;;  %v2200_v54 = vrot.slane %v51_v52, %v2187_v47  ;;  %v2203_v55 = vrot.slane %v52_v53, %v2187_v47 }
  0xf6   :  { %v283_v56 = vpop.f32.mrf.mxu0 }
  0xf8   :  { %v285_v57 = vpop.f32.mrf.mxu0 }
  0xf9   :  { %652 = vrot.lane.b32.xlu1 %v283_v56, %s1895_s16  ;;  %648 = vrot.lane.b32.xlu0 %v285_v57, %s1895_s16  ;;  %v2205_v56 = vsub.s32 3, %v385_v45 }
  0xfa   :  { %v2155_v58 = vpop.f32.mrf.mxu0 }
  0xfc   :  { %v2157_v59 = vpop.f32.mrf.mxu0 }
  0xfe   :  { %v295_v60 = vpop.f32.mrf.mxu0 }
  0xff   :  { %685 = vrot.lane.b32.xlu0 %v295_v60, %s1896_s17  ;;  %v2207_v60 = vsub.s32 4, %v385_v45 }
 0x100   :  { %v297_v61 = vpop.f32.mrf.mxu0 }
 0x101   :  { %687 = vrot.lane.b32.xlu1 %v297_v61, %s1896_s17  ;;  %v2210_v61 = vrot.slane %v51_v52, %v2189_v49 }
 0x102   :  { %v301_v62 = vpop.f32.mrf.mxu0 }
 0x103   :  { %709 = vrot.lane.b32.xlu0 %v301_v62, %s1897_s18 }
 0x104   :  { %v303_v63 = vpop.f32.mrf.mxu0 }
 0x105   :  { %711 = vrot.lane.b32.xlu1 %v303_v63, %s1897_s18 }
 0x106   :  { %v307_v0 = vpop.f32.mrf.mxu0 }
 0x107   :  { %733 = vrot.lane.b32.xlu0 %v307_v0, %s1898_s19  ;;  %v2215_v0 = vrot.slane %v52_v53, %v2189_v49 }
 0x108   :  { %v309_v1 = vpop.f32.mrf.mxu0 }
 0x109   :  { %735 = vrot.lane.b32.xlu1 %v309_v1, %s1898_s19  ;;  %v2218_v1 = vrot.slane %v51_v52, %v2191_v50 }
 0x10a   :  { %v313_v2 = vpop.f32.mrf.mxu0 }
 0x10b   :  { %757 = vrot.lane.b32.xlu0 %v313_v2, %s1899_s20  ;;  %v2221_v2 = vrot.slane %v52_v53, %v2191_v50 }
 0x10c   :  { %v315_v4 = vpop.f32.mrf.mxu0 }
 0x10d   :  { %759 = vrot.lane.b32.xlu1 %v315_v4, %s1899_s20 }
 0x10e   :  { %v319_v5 = vpop.f32.mrf.mxu0 }
 0x110   :  { %v321_v6 = vpop.f32.mrf.mxu0 }
 0x111   :  { %784 = vrot.lane.b32.xlu1 %v319_v5, %s1900_s21  ;;  %780 = vrot.lane.b32.xlu0 %v321_v6, %s1900_s21 }
 0x112   :  { %v325_v7 = vpop.f32.mrf.mxu0 }
 0x114   :  { %v327_v8 = vpop.f32.mrf.mxu0 }
 0x115   :  { %808 = vrot.lane.b32.xlu1 %v325_v7, %s1901_s22  ;;  %804 = vrot.lane.b32.xlu0 %v327_v8, %s1901_s22 }
 0x116   :  { %v331_v9 = vpop.f32.mrf.mxu0 }
 0x118   :  { %v333_v10 = vpop.f32.mrf.mxu0 }
 0x119   :  { %832 = vrot.lane.b32.xlu1 %v331_v9, %s2940_s23  ;;  %828 = vrot.lane.b32.xlu0 %v333_v10, %s2940_s23 }
 0x11a   :  { %v337_v11 = vpop.f32.mrf.mxu0 }
 0x11c   :  { %v339_v12 = vpop.f32.mrf.mxu0 }
 0x11d   :  { %856 = vrot.lane.b32.xlu1 %v337_v11, %s2938_s24  ;;  %852 = vrot.lane.b32.xlu0 %v339_v12, %s2938_s24  ;;  %v2230_v11 = vrot.slane %v51_v52, %v2205_v56  ;;  %v2233_v12 = vrot.slane %v52_v53, %v2205_v56 }
 0x11e   :  { %v2175_v13 = vpop.f32.mrf.mxu0 }
 0x11f   :  { %2943 = vst [vmem:[#allocation2_spill] sm:$0xff] %v2230_v11  ;;  %2944 = vst [vmem:[#allocation3_spill] sm:$0xff] %v2233_v12 }
 0x120   :  { %v2177_v14 = vpop.f32.mrf.mxu0 }
 0x122   :  { %v349_v15 = vpop.f32.mrf.mxu0 }
 0x123   :  { %889 = vrot.lane.b32.xlu0 %v349_v15, %s2936_s25 }
 0x124   :  { %v351_v16 = vpop.f32.mrf.mxu0 }
 0x125   :  { %891 = vrot.lane.b32.xlu1 %v351_v16, %s2936_s25  ;;  %v2236_v16 = vrot.slane %v51_v52, %v2207_v60 }
 0x126   :  { %v355_v17 = vpop.f32.mrf.mxu0 }
 0x127   :  { %913 = vrot.lane.b32.xlu0 %v355_v17, %s2898_s26  ;;  %2945 = vst [vmem:[#allocation4_spill] sm:$0xff] %v2236_v16  ;;  %v2239_v17 = vrot.slane %v52_v53, %v2207_v60 }
 0x128   :  { %v357_v18 = vpop.f32.mrf.mxu0 }
 0x129   :  { %915 = vrot.lane.b32.xlu1 %v357_v18, %s2898_s26  ;;  %2946 = vst [vmem:[#allocation5_spill] sm:$0xff] %v2239_v17 }
 0x12a   :  { %v361_v32 = vpop.f32.mrf.mxu0 }
 0x12b   :  { %937 = vrot.lane.b32.xlu0 %v361_v32, %s2894_s27 }
 0x12c   :  { %v363_v33 = vpop.f32.mrf.mxu0 }
 0x12d   :  { %939 = vrot.lane.b32.xlu1 %v363_v33, %s2894_s27 }
 0x12e   :  { %v367_v34 = vpop.f32.mrf.mxu0 }
 0x12f   :  { %961 = vrot.lane.b32.xlu0 %v367_v34, %s2896_s28 }
 0x130   :  { %v369_v35 = vpop.f32.mrf.mxu0 }
 0x131   :  { %963 = vrot.lane.b32.xlu1 %v369_v35, %s2896_s28 }
 0x139   :  { %v378_v36 = vpop.permute.xlu0 %377 }
 0x13d   :  { %v402_v37 = vpop.permute.xlu1 %401  ;;  %v374_v38 = vpop.permute.xlu0 %373 }
 0x13e   :  { %v380_v5 = vsel %vm379_vm1, %v378_v36, %v374_v38  ;;  %v383_v6 = vsel %vm379_vm1, %v374_v38, %v378_v36  ;;  %v2247_v38 = vsub.s32 5, %v385_v45 }
 0x13f   :  { %v392_v33 = vmul.f32 %v2210_v61, %v383_v6  ;;  %v393_v34 = vmul.f32 %v2215_v0, %v380_v5 }
 0x140   :  { %v2259_v5 = vrot.slane %v52_v53, %v2247_v38 }
 0x141   :  { %v398_v39 = vpop.permute.xlu1 %397 }
 0x142   :  { %v403_v62 = vsel %vm63_vm0, %v402_v37, %v398_v39  ;;  %v406_v63 = vsel %vm63_vm0, %v398_v39, %v402_v37  ;;  %v2249_v39 = vsub.s32 6, %v385_v45  ;;  %2948 = vst [vmem:[#allocation7_spill] sm:$0xff] %v2259_v5 }
 0x143   :  { %v421_v42 = vpop.permute.xlu0 %420  ;;  %v415_v9 = vmul.f32 %v2200_v54, %v406_v63  ;;  %v416_v10 = vmul.f32 %v2203_v55, %v403_v62  ;;  %v2256_v63 = vrot.slane %v51_v52, %v2247_v38 }
 0x144   :  { %v2262_v6 = vrot.slane %v51_v52, %v2249_v39 }
 0x145   :  { %v425_v44 = vpop.permute.xlu1 %424  ;;  %v417_v43 = vadd.f32 %v415_v9, %v392_v33  ;;  %2947 = vst [vmem:[#allocation6_spill] sm:$0xff] %v2256_v63  ;;  %v2267_v9 = vrot.slane %v52_v53, %v2249_v39  ;;  %v476_v33 = vmul.f32 %v2239_v17, %v2137_v41 }
 0x146   :  { %v427_v7 = vsel %vm426_vm2, %v425_v44, %v421_v42  ;;  %v430_v8 = vsel %vm426_vm2, %v421_v42, %v425_v44  ;;  %v2251_v42 = vsub.s32 7, %v385_v45  ;;  %v418_v44 = vadd.f32 %v416_v10, %v393_v34 }
 0x147   :  { %v445_v46 = vpop.permute.xlu0 %444  ;;  %v439_v35 = vmul.f32 %v2218_v1, %v430_v8  ;;  %v440_v36 = vmul.f32 %v2221_v2, %v427_v7  ;;  %v475_v45 = vmul.f32 %v2236_v16, %v2134_v40  ;;  %v2279_v40 = vld [vmem:[%s2890_s4 + $0x10] sm:$0xff] }
 0x149   :  { %v449_v48 = vpop.permute.xlu1 %448  ;;  %v441_v7 = vadd.f32 %v439_v35, %v417_v43  ;;  %v442_v8 = vadd.f32 %v440_v36, %v418_v44  ;;  %v2282_v36 = vrot.slane %v52_v53, %v2251_v42 }
 0x14a   :  { %v451_v18 = vsel %vm450_vm3, %v449_v48, %v445_v46  ;;  %v454_v32 = vsel %vm450_vm3, %v445_v46, %v449_v48 }
 0x14b   :  { %v463_v46 = vmul.f32 %v2230_v11, %v454_v32  ;;  %v464_v48 = vmul.f32 %v2233_v12, %v451_v18  ;;  %v2272_v32 = vrot.slane %v51_v52, %v2251_v42  ;;  %2949 = vst [vmem:[#allocation8_spill] sm:$0xff] %v2282_v36 }
 0x14d   :  { %v482_v51 = vpop.permute.xlu0 %481  ;;  %v465_v34 = vadd.f32 %v463_v46, %v441_v7  ;;  %v466_v35 = vadd.f32 %v464_v48, %v442_v8 }
 0x14f   :  { %v484_v57 = vpop.permute.xlu1 %483  ;;  %v478_v3 = vadd.f32 %v476_v33, %v466_v35 }
 0x150   :  { %v486_v10 = vsel %vm485_vm4, %v482_v51, %v484_v57  ;;  %v490_v18 = vsel %vm485_vm4, %v484_v57, %v482_v51  ;;  %v2287_v51 = vld [vmem:[%s2890_s4 + $0x18] sm:$0xff]  ;;  %v2293_v57 = vrot.slane %v2279_v40, %v2189_v49 }
 0x151   :  { %v506_v4 = vpop.permute.xlu0 %505  ;;  %v499_v46 = vmul.f32 %v2256_v63, %v486_v10  ;;  %v500_v53 = vmul.f32 %v2259_v5, %v490_v18  ;;  %v2299_v48 = vrot.slane %v2287_v51, %v2189_v49  ;;  %v477_v10 = vadd.f32 %v475_v45, %v465_v34 }
 0x152   :  { %2950 = vst [vmem:[#allocation9_spill] sm:$0xff] %v2293_v57 }
 0x153   :  { %v508_v15 = vpop.permute.xlu1 %507  ;;  %2951 = vst [vmem:[#allocation10_spill] sm:$0xff] %v2299_v48  ;;  %v501_v12 = vadd.f32 %v499_v46, %v477_v10  ;;  %v502_v11 = vadd.f32 %v500_v53, %v478_v3 }
 0x154   :  { %v510_v52 = vsel %vm509_vm5, %v506_v4, %v508_v15  ;;  %v514_v41 = vsel %vm509_vm5, %v508_v15, %v506_v4  ;;  %v2305_v4 = vrot.slane %v2279_v40, %v2187_v47  ;;  %v2309_v15 = vrot.slane %v2287_v51, %v2187_v47 }
 0x155   :  { %v530_v37 = vpop.permute.xlu0 %529  ;;  %v523_v18 = vmul.f32 %v2262_v6, %v510_v52  ;;  %v524_v5 = vmul.f32 %v2267_v9, %v514_v41  ;;  %v2325_v52 = vrot.slane %v2287_v51, %v2191_v50 }
 0x156   :  { %2952 = vst [vmem:[#allocation11_spill] sm:$0xff] %v2309_v15 }
 0x157   :  { %v532_v62 = vpop.permute.xlu1 %531  ;;  %2954 = vst [vmem:[#allocation13_spill] sm:$0xff] %v2325_v52 }
 0x158   :  { %v534_v7 = vsel %vm533_vm6, %v530_v37, %v532_v62  ;;  %v538_v8 = vsel %vm533_vm6, %v532_v62, %v530_v37  ;;  %v2317_v62 = vrot.slane %v2279_v40, %v2191_v50 }
 0x159   :  { %v554_v43 = vpop.permute.xlu0 %553  ;;  %v547_v45 = vmul.f32 %v2272_v32, %v534_v7  ;;  %v548_v33 = vmul.f32 %v2282_v36, %v538_v8 }
 0x15a   :  { %2953 = vst [vmem:[#allocation12_spill] sm:$0xff] %v2317_v62 }
 0x15b   :  { %v556_v44 = vpop.permute.xlu1 %555 }
 0x15c   :  { %v558_v16 = vsel %vm557_vm7, %v554_v43, %v556_v44  ;;  %v562_v37 = vsel %vm557_vm7, %v556_v44, %v554_v43  ;;  %v525_v43 = vadd.f32 %v523_v18, %v501_v12  ;;  %v526_v44 = vadd.f32 %v524_v5, %v502_v11 }
 0x15d   :  { %v571_v41 = vmul.f32 %v2293_v57, %v558_v16  ;;  %v572_v46 = vmul.f32 %v2299_v48, %v562_v37 }
 0x15e   :  { %v549_v12 = vadd.f32 %v547_v45, %v525_v43  ;;  %v550_v11 = vadd.f32 %v548_v33, %v526_v44  ;;  %v2347_v45 = vrot.slane %v2279_v40, %v2207_v60  ;;  %v2351_v33 = vrot.slane %v2287_v51, %v2207_v60 }
 0x15f   :  { %v581_v63 = vpop.permute.xlu1 %580  ;;  %v577_v17 = vpop.permute.xlu0 %576 }
 0x160   :  { %v583_v34 = vsel %vm582_vm8, %v581_v63, %v577_v17  ;;  %v586_v35 = vsel %vm582_vm8, %v577_v17, %v581_v63  ;;  %v2333_v17 = vrot.slane %v2279_v40, %v2205_v56  ;;  %v2337_v63 = vrot.slane %v2287_v51, %v2205_v56  ;;  %2957 = vst [vmem:[#allocation16_spill] sm:$0xff] %v2347_v45 }
 0x161   :  { %v595_v16 = vmul.f32 %v2305_v4, %v586_v35  ;;  %v596_v5 = vmul.f32 %v2309_v15, %v583_v34  ;;  %v573_v10 = vadd.f32 %v571_v41, %v549_v12  ;;  %v574_v18 = vadd.f32 %v572_v46, %v550_v11  ;;  %2958 = vst [vmem:[#allocation17_spill] sm:$0xff] %v2351_v33 }
 0x162   :  { %2955 = vst [vmem:[#allocation14_spill] sm:$0xff] %v2333_v17  ;;  %2956 = vst [vmem:[#allocation15_spill] sm:$0xff] %v2337_v63  ;;  %v2357_v41 = vrot.slane %v2279_v40, %v2247_v38 }
 0x163   :  { %v605_v3 = vpop.permute.xlu1 %604  ;;  %v601_v53 = vpop.permute.xlu0 %600  ;;  %v597_v34 = vadd.f32 %v595_v16, %v573_v10  ;;  %v598_v35 = vadd.f32 %v596_v5, %v574_v18 }
 0x164   :  { %v607_v7 = vsel %vm606_vm9, %v605_v3, %v601_v53  ;;  %v610_v8 = vsel %vm606_vm9, %v601_v53, %v605_v3  ;;  %2959 = vst [vmem:[#allocation18_spill] sm:$0xff] %v2357_v41  ;;  %v679_v18 = vmul.f32 %v2357_v41, %v2155_v58  ;;  %v2377_v58 = vrot.slane %v2287_v51, %v2249_v39 }
 0x165   :  { %v619_v37 = vmul.f32 %v2317_v62, %v610_v8  ;;  %v620_v3 = vmul.f32 %v2325_v52, %v607_v7 }
 0x166   :  { %2962 = vst [vmem:[#allocation21_spill] sm:$0xff] %v2377_v58 }
 0x167   :  { %v629_v53 = vpop.permute.xlu1 %628  ;;  %v625_v48 = vpop.permute.xlu0 %624  ;;  %v621_v46 = vadd.f32 %v619_v37, %v597_v34  ;;  %v622_v7 = vadd.f32 %v620_v3, %v598_v35 }
 0x168   :  { %v631_v57 = vsel %vm630_vm10, %v629_v53, %v625_v48  ;;  %v634_v36 = vsel %vm630_vm10, %v625_v48, %v629_v53  ;;  %v2361_v48 = vrot.slane %v2287_v51, %v2247_v38 }
 0x169   :  { %v643_v43 = vmul.f32 %v2333_v17, %v634_v36  ;;  %v644_v44 = vmul.f32 %v2337_v63, %v631_v57 }
 0x16a   :  { %2960 = vst [vmem:[#allocation19_spill] sm:$0xff] %v2361_v48  ;;  %v680_v53 = vmul.f32 %v2361_v48, %v2157_v59 }
 0x16b   :  { %v653_v8 = vpop.permute.xlu1 %652  ;;  %v649_v12 = vpop.permute.xlu0 %648  ;;  %v645_v5 = vadd.f32 %v643_v43, %v621_v46  ;;  %v646_v36 = vadd.f32 %v644_v44, %v622_v7  ;;  %v2373_v46 = vrot.slane %v2279_v40, %v2249_v39 }
 0x16c   :  { %v655_v11 = vsel %vm654_vm11, %v653_v8, %v649_v12  ;;  %v658_v16 = vsel %vm654_vm11, %v649_v12, %v653_v8  ;;  %v2384_v12 = vld [vmem:[%s2890_s4 + $0x20] sm:$0xff] }
 0x16d   :  { %v667_v57 = vmul.f32 %v2347_v45, %v658_v16  ;;  %v668_v10 = vmul.f32 %v2351_v33, %v655_v11  ;;  %2961 = vst [vmem:[#allocation20_spill] sm:$0xff] %v2373_v46  ;;  %v2389_v11 = vld [vmem:[%s2890_s4 + $0x28] sm:$0xff]  ;;  %v2393_v16 = vrot.slane %v2279_v40, %v2251_v42 }
 0x16e   :  { %v2443_v62 = vrot.slane %v2389_v11, %v2205_v56 }
 0x16f   :  { %v669_v37 = vadd.f32 %v667_v57, %v645_v5  ;;  %v670_v3 = vadd.f32 %v668_v10, %v646_v36  ;;  %2963 = vst [vmem:[#allocation22_spill] sm:$0xff] %v2393_v16  ;;  %v2397_v5 = vrot.slane %v2287_v51, %v2251_v42 }
 0x171   :  { %v686_v34 = vpop.permute.xlu0 %685  ;;  %v681_v35 = vadd.f32 %v679_v18, %v669_v37  ;;  %v682_v63 = vadd.f32 %v680_v53, %v670_v3  ;;  %2964 = vst [vmem:[#allocation23_spill] sm:$0xff] %v2397_v5  ;;  %v2403_v18 = vrot.slane %v2384_v12, %v2189_v49  ;;  %v2407_v53 = vrot.slane %v2389_v11, %v2189_v49 }
 0x172   :  { %v2413_v37 = vrot.slane %v2384_v12, %v2187_v47 }
 0x173   :  { %v688_v17 = vpop.permute.xlu1 %687 }
 0x174   :  { %v690_v59 = vsel %vm689_vm12, %v686_v34, %v688_v17  ;;  %v694_v7 = vsel %vm689_vm12, %v688_v17, %v686_v34  ;;  %v2419_v34 = vrot.slane %v2389_v11, %v2187_v47 }
 0x175   :  { %v710_v52 = vpop.permute.xlu0 %709  ;;  %v703_v40 = vmul.f32 %v2373_v46, %v690_v59  ;;  %v704_v51 = vmul.f32 %v2377_v58, %v694_v7  ;;  %v2425_v7 = vrot.slane %v2384_v12, %v2191_v50  ;;  %v2429_v58 = vrot.slane %v2389_v11, %v2191_v50 }
 0x176   :  { %2965 = vst [vmem:[#allocation24_spill] sm:$0xff] %v2419_v34 }
 0x177   :  { %v712_v8 = vpop.permute.xlu1 %711 }
 0x178   :  { %v714_v57 = vsel %vm2914_vm13, %v710_v52, %v712_v8  ;;  %v718_v10 = vsel %vm2914_vm13, %v712_v8, %v710_v52  ;;  %vm2927_vm13 = vcmask 416768  }
 0x179   :  { %v734_v43 = vpop.permute.xlu0 %733  ;;  %v727_v8 = vmul.f32 %v2393_v16, %v714_v57  ;;  %v728_v59 = vmul.f32 %v2397_v5, %v718_v10  ;;  %v2435_v57 = vrot.slane %v2384_v12, %v2205_v56  ;;  %v705_v10 = vadd.f32 %v703_v40, %v681_v35 }
 0x17a   :  { %v706_v5 = vadd.f32 %v704_v51, %v682_v63  ;;  %v2455_v56 = vrot.slane %v2389_v11, %v2207_v60 }
 0x17b   :  { %v736_v44 = vpop.permute.xlu1 %735 }
 0x17c   :  { %v738_v3 = vsel %vm2918_vm14, %v734_v43, %v736_v44  ;;  %v742_v52 = vsel %vm2918_vm14, %v736_v44, %v734_v43  ;;  %vm2931_vm14 = vcmask 392192  }
 0x17d   :  { %v758_v17 = vpop.permute.xlu0 %757  ;;  %v751_v16 = vmul.f32 %v2403_v18, %v738_v3  ;;  %v752_v41 = vmul.f32 %v2407_v53, %v742_v52 }
 0x17f   :  { %v760_v36 = vpop.permute.xlu1 %759 }
 0x180   :  { %v762_v43 = vsel %vm2925_vm15, %v758_v17, %v760_v36  ;;  %v766_v44 = vsel %vm2925_vm15, %v760_v36, %v758_v17  ;;  %vm2929_vm15 = vcmask 367616   ;;  %v729_v17 = vadd.f32 %v727_v8, %v705_v10 }
 0x181   :  { %v730_v36 = vadd.f32 %v728_v59, %v706_v5  ;;  %v775_v15 = vmul.f32 %v2413_v37, %v762_v43  ;;  %v776_v35 = vmul.f32 %v2419_v34, %v766_v44 }
 0x183   :  { %v785_v46 = vpop.permute.xlu1 %784  ;;  %v781_v48 = vpop.permute.xlu0 %780  ;;  %v754_v5 = vadd.f32 %v752_v41, %v730_v36  ;;  %v2465_v41 = vrot.slane %v2384_v12, %v2247_v38  ;;  %v2475_v36 = vrot.slane %v2384_v12, %v2249_v39 }
 0x184   :  { %v787_v33 = vsel %vm2927_vm13, %v785_v46, %v781_v48  ;;  %v790_v45 = vsel %vm2927_vm13, %v781_v48, %v785_v46  ;;  %v2451_v48 = vrot.slane %v2384_v12, %v2207_v60  ;;  %v753_v46 = vadd.f32 %v751_v16, %v729_v17 }
 0x185   :  { %v799_v52 = vmul.f32 %v2425_v7, %v790_v45  ;;  %v800_v8 = vmul.f32 %v2429_v58, %v787_v33  ;;  %vm2930_vm13 = vcmask 23552   ;;  %v778_v43 = vadd.f32 %v776_v35, %v754_v5 }
 0x186   :  { %v777_v59 = vadd.f32 %v775_v15, %v753_v46  ;;  %v2469_v45 = vrot.slane %v2389_v11, %v2247_v38  ;;  %v2479_v35 = vrot.slane %v2389_v11, %v2249_v39 }
 0x187   :  { %v809_v63 = vpop.permute.xlu1 %808  ;;  %v805_v40 = vpop.permute.xlu0 %804  ;;  %v802_v33 = vadd.f32 %v800_v8, %v778_v43 }
 0x188   :  { %v811_v51 = vsel %vm2931_vm14, %v809_v63, %v805_v40  ;;  %v814_v3 = vsel %vm2931_vm14, %v805_v40, %v809_v63  ;;  %v801_v15 = vadd.f32 %v799_v52, %v777_v59  ;;  %v884_v39 = vmul.f32 %v2479_v35, %v2177_v14 }
 0x189   :  { %v823_v44 = vmul.f32 %v2435_v57, %v814_v3  ;;  %v824_v10 = vmul.f32 %v2443_v62, %v811_v51  ;;  %v2501_v14 = vrot.slane %v2389_v11, %v2251_v42  ;;  %vm2935_vm14 = vcmask 654336  }
 0x18b   :  { %v833_v63 = vpop.permute.xlu1 %832  ;;  %v829_v40 = vpop.permute.xlu0 %828  ;;  %v825_v51 = vadd.f32 %v823_v44, %v801_v15  ;;  %v826_v3 = vadd.f32 %v824_v10, %v802_v33 }
 0x18c   :  { %v835_v34 = vsel %vm2929_vm15, %v833_v63, %v829_v40  ;;  %v838_v60 = vsel %vm2929_vm15, %v829_v40, %v833_v63  ;;  %v883_v63 = vmul.f32 %v2475_v36, %v2175_v13  ;;  %vm2932_vm15 = vcmask 1022976  }
 0x18d   :  { %v847_v16 = vmul.f32 %v2451_v48, %v838_v60  ;;  %v848_v17 = vmul.f32 %v2455_v56, %v835_v34  ;;  %v2497_v13 = vrot.slane %v2384_v12, %v2251_v42 }
 0x18f   :  { %v857_v46 = vpop.permute.xlu1 %856  ;;  %v853_v5 = vpop.permute.xlu0 %852  ;;  %v849_v8 = vadd.f32 %v847_v16, %v825_v51  ;;  %v850_v59 = vadd.f32 %v848_v17, %v826_v3  ;;  %v57_v16 = vld [vmem:[%s2890_s4 + $0x30] sm:$0x7]  ;;  %v58_v17 = vld [vmem:[%s2890_s4 + $0x38] sm:$0x7] }
 0x190   :  { %v859_v38 = vsel %vm2930_vm13, %v857_v46, %v853_v5  ;;  %v862_v52 = vsel %vm2930_vm13, %v853_v5, %v857_v46  ;;  %vm917_vm13 = vcmask 678912   ;;  %v2506_v5 = vrot.slane %v57_v16, %v2189_v49 }
 0x191   :  { %v871_v34 = vmul.f32 %v2465_v41, %v862_v52  ;;  %v872_v43 = vmul.f32 %v2469_v45, %v859_v38  ;;  %v2509_v38 = vrot.slane %v58_v17, %v2189_v49 }
 0x192   :  { %2966 = vst [vmem:[#allocation25_spill] sm:$0xff] %v2506_v5 }
 0x193   :  { %v873_v44 = vadd.f32 %v871_v34, %v849_v8  ;;  %v874_v10 = vadd.f32 %v872_v43, %v850_v59  ;;  %2967 = vst [vmem:[#allocation26_spill] sm:$0xff] %v2509_v38  ;;  %v2516_v34 = vrot.slane %v57_v16, %v2187_v47  ;;  %v2519_v43 = vrot.slane %v58_v17, %v2187_v47 }
 0x195   :  { %v890_v40 = vpop.permute.xlu0 %889  ;;  %v885_v60 = vadd.f32 %v883_v63, %v873_v44  ;;  %v886_v15 = vadd.f32 %v884_v39, %v874_v10 }
 0x197   :  { %v892_v33 = vpop.permute.xlu1 %891 }
 0x198   :  { %v894_v3 = vsel %vm2932_vm15, %v890_v40, %v892_v33  ;;  %v898_v46 = vsel %vm2932_vm15, %v892_v33, %v890_v40  ;;  %vm965_vm15 = vcmask 629760   ;;  %v2526_v40 = vrot.slane %v57_v16, %v2191_v50 }
 0x199   :  { %v914_v51 = vpop.permute.xlu0 %913  ;;  %v907_v42 = vmul.f32 %v2497_v13, %v894_v3  ;;  %v908_v11 = vmul.f32 %v2501_v14, %v898_v46  ;;  %v2529_v33 = vrot.slane %v58_v17, %v2191_v50 }
 0x19b   :  { %v916_v52 = vpop.permute.xlu1 %915  ;;  %v910_v3 = vadd.f32 %v908_v11, %v886_v15 }
 0x19c   :  { %v918_v12 = vsel %vm917_vm13, %v914_v51, %v916_v52  ;;  %v922_v8 = vsel %vm917_vm13, %v916_v52, %v914_v51  ;;  %v909_v51 = vadd.f32 %v907_v42, %v885_v60 }
 0x19d   :  { %v938_v59 = vpop.permute.xlu0 %937  ;;  %v931_v49 = vmul.f32 %v2506_v5, %v918_v12  ;;  %v932_v63 = vmul.f32 %v2509_v38, %v922_v8 }
 0x19f   :  { %v940_v39 = vpop.permute.xlu1 %939  ;;  %v933_v52 = vadd.f32 %v931_v49, %v909_v51  ;;  %v934_v38 = vadd.f32 %v932_v63, %v910_v3  ;;  %v2540_v49 = vld [vmem:[%s2891_s2] sm:$0xff]  ;;  %v1807_v63 = vld [vmem:[%s2888_s0 + $0x38] sm:$0xff]  ;;  %v2560_v51 = vld [vmem:[%s2891_s2 + $0x8] sm:$0xff] }
 0x1a0   :  { %v942_v44 = vsel %vm2935_vm14, %v938_v59, %v940_v39  ;;  %v946_v10 = vsel %vm2935_vm14, %v940_v39, %v938_v59  ;;  %vm995_vm14 = vcmask 64512   ;;  %2969 = vst [vmem:[#allocation27_spill] sm:$0xff] %v2560_v51  ;;  %v1869_v3 = vld [vmem:[%s2889_s1] sm:$0xff] }
 0x1a1   :  { %v955_v47 = vmul.f32 %v2516_v34, %v942_v44  ;;  %v956_v46 = vmul.f32 %v2519_v43, %v946_v10  ;;  %v962_v12 = vpop.permute.xlu0 %961  ;;  %v1804_v44 = vld [vmem:[%s2888_s0 + $0x20] sm:$0xff]  ;;  %v2968_v10 = vmov 0.0  }
 0x1a3   :  { %v964_v8 = vpop.permute.xlu1 %963  ;;  %v958_v39 = vadd.f32 %v956_v46, %v934_v38  ;;  %v957_v17 = vadd.f32 %v955_v47, %v933_v52  ;;  %v1805_v38 = vld [vmem:[%s2888_s0 + $0x28] sm:$0xff]  ;;  %v1871_v46 = vld [vmem:[%s2889_s1 + $0x10] sm:$0xff]  ;;  %v1872_v52 = vld [vmem:[%s2889_s1 + $0x18] sm:$0xff] }
 0x1a4   :  { %v966_v5 = vsel %vm965_vm15, %v962_v12, %v964_v8  ;;  %v970_v59 = vsel %vm965_vm15, %v964_v8, %v962_v12  ;;  %v1870_v47 = vld [vmem:[%s2889_s1 + $0x8] sm:$0xff]  ;;  %v1873_v12 = vld [vmem:[%s2889_s1 + $0x20] sm:$0xff] }
 0x1a5   :  { %v979_v16 = vmul.f32 %v2526_v40, %v966_v5  ;;  %v980_v50 = vmul.f32 %v2529_v33, %v970_v59  ;;  %v1806_v5 = vld [vmem:[%s2888_s0 + $0x30] sm:$0xff]  ;;  %v1874_v8 = vld [vmem:[%s2889_s1 + $0x28] sm:$0xff] }
 0x1a6   :  { %v1875_v59 = vld [vmem:[%s2889_s1 + $0x30] sm:$0xff] }
 0x1a7   :  { %v982_v60 = vadd.f32 %v980_v50, %v958_v39  ;;  %v981_v15 = vadd.f32 %v979_v16, %v957_v17  ;;  %v1876_v16 = vld [vmem:[%s2889_s1 + $0x38] sm:$0xff]  ;;  %v1877_v39 = vld [vmem:[%s2889_s1 + $0x40] sm:$0xff]  ;;  %v1878_v50 = vld [vmem:[%s2889_s1 + $0x48] sm:$0xff] }
 0x1a8   :  { %v1879_v17 = vld [vmem:[%s2889_s1 + $0x50] sm:$0xff] }
 0x1a9   :  { %v984_v42 = vmax.f32 %v982_v60, 0.0  ;;  %v983_v11 = vmax.f32 %v981_v15, 0.0  ;;  %v1880_v60 = vld [vmem:[%s2889_s1 + $0x58] sm:$0xff]  ;;  %v1881_v15 = vld [vmem:[%s2889_s1 + $0x60] sm:$0xff] }
 0x1ab   :  { %1032 = vmatprep.subr.mxu1 %v984_v42  ;;  %v1882_v42 = vld [vmem:[%s2889_s1 + $0x68] sm:$0xff]  ;;  %s2973_s1 = smov 45  }
 0x1ac   :  { %1033 = vmatpush1.msra.mxu1 %v983_v11 }
 0x1ad   :  { %1802 = vmatmul.mubr.msk.f32.vlgmr.msra.gmra.mxu1 %vm995_vm14, %v2540_v49  ;;  %1116 = vmatprep.subr.mxu1 %v1807_v63 }
 0x1ae   :  { %1072 = vmatprep.mubr.f32.mxu1 %v2968_v10  ;;  %1117 = vmatpush1.msra.mxu1 %v1806_v5 }
 0x1af   :  { %1118 = vmatprep.subr.mxu1 %v1805_v38 }
 0x1b0   :  { %1119 = vmatpush1.msra.mxu1 %v1804_v44 }
 0x1b1   :  { %1803 = vmatmul.mubr.msk.f32.gmra.mxu1 %vm995_vm14, %v2560_v51 }
 0x1b2   :  { %1152 = vmatprep.mubr.f32.mxu1 %v2968_v10 }
 0x1b5   :  { %1808 = vmatmul.mubr.msk.f32.vlgmr.msra.gmra.mxu1 %vm63_vm0, %v1869_v3 }
 0x1b6   :  { %1158 = vmatprep.mubr.f32.mxu1 %v2968_v10 }
 0x1b9   :  { %1809 = vmatmul.mubr.msk.f32.gmra.mxu1 %vm63_vm0, %v1870_v47 }
 0x1ba   :  { %1164 = vmatprep.mubr.f32.mxu1 %v2968_v10 }
 0x1bd   :  { %1810 = vmatmul.mubr.msk.f32.gmra.mxu1 %vm63_vm0, %v1871_v46 }
 0x1be   :  { %1170 = vmatprep.mubr.f32.mxu1 %v2968_v10 }
 0x1c1   :  { %1811 = vmatmul.mubr.msk.f32.gmra.mxu1 %vm63_vm0, %v1872_v52 }
 0x1c2   :  { %1176 = vmatprep.mubr.f32.mxu1 %v2968_v10 }
 0x1c5   :  { %1812 = vmatmul.mubr.msk.f32.gmra.mxu1 %vm63_vm0, %v1873_v12 }
 0x1c6   :  { %1182 = vmatprep.mubr.f32.mxu1 %v2968_v10 }
 0x1c9   :  { %1813 = vmatmul.mubr.msk.f32.gmra.mxu1 %vm63_vm0, %v1874_v8 }
 0x1ca   :  { %1188 = vmatprep.mubr.f32.mxu1 %v2968_v10 }
 0x1cd   :  { %1814 = vmatmul.mubr.msk.f32.gmra.mxu1 %vm63_vm0, %v1875_v59 }
 0x1ce   :  { %1194 = vmatprep.mubr.f32.mxu1 %v2968_v10 }
 0x1d1   :  { %1815 = vmatmul.mubr.msk.f32.gmra.mxu1 %vm63_vm0, %v1876_v16 }
 0x1d2   :  { %1200 = vmatprep.mubr.f32.mxu1 %v2968_v10 }
 0x1d5   :  { %1816 = vmatmul.mubr.msk.f32.gmra.mxu1 %vm63_vm0, %v1877_v39 }
 0x1d6   :  { %1206 = vmatprep.mubr.f32.mxu1 %v2968_v10 }
 0x1d9   :  { %1817 = vmatmul.mubr.msk.f32.gmra.mxu1 %vm63_vm0, %v1878_v50 }
 0x1da   :  { %1212 = vmatprep.mubr.f32.mxu1 %v2968_v10 }
 0x1dd   :  { %1818 = vmatmul.mubr.msk.f32.gmra.mxu1 %vm63_vm0, %v1879_v17 }
 0x1de   :  { %1218 = vmatprep.mubr.f32.mxu1 %v2968_v10 }
 0x1e1   :  { %1819 = vmatmul.mubr.msk.f32.gmra.mxu1 %vm63_vm0, %v1880_v60 }
 0x1e2   :  { %1224 = vmatprep.mubr.f32.mxu1 %v2968_v10 }
 0x1e5   :  { %1820 = vmatmul.mubr.msk.f32.gmra.mxu1 %vm63_vm0, %v1881_v15 }
 0x1e6   :  { %1230 = vmatprep.mubr.f32.mxu1 %v2968_v10 }
 0x1e9   :  { %1821 = vmatmul.mubr.msk.f32.gmra.mxu1 %vm63_vm0, %v1882_v42 }
 0x1ea   :  { %1236 = vmatprep.mubr.f32.mxu1 %v2968_v10 }
 0x1ed   :  { %1822 = vmatmul.mubr.msk.f32.gmra.mxu1 %vm63_vm0, %v2026_v19  ;;  %v1908_v19 = vmov 0  }
 0x1ee   :  { %1242 = vmatprep.mubr.f32.mxu1 %v2968_v10  ;;  %1867 = vset.pattern.permute.xlu0 %v1908_v19 }
 0x1ef   :  { %1868 = vset.pattern.permute.xlu1 %v1908_v19 }
 0x1f1   :  { %1823 = vmatmul.mubr.msk.f32.gmra.mxu1 %vm63_vm0, %v2034_v20 }
 0x1f2   :  { %1248 = vmatprep.mubr.f32.mxu1 %v2968_v10 }
 0x1f5   :  { %1824 = vmatmul.mubr.msk.f32.gmra.mxu1 %vm63_vm0, %v2042_v21 }
 0x1f6   :  { %1254 = vmatprep.mubr.f32.mxu1 %v2968_v10 }
 0x1f9   :  { %1825 = vmatmul.mubr.msk.f32.gmra.mxu1 %vm63_vm0, %v2050_v22 }
 0x1fa   :  { %1260 = vmatprep.mubr.f32.mxu1 %v2968_v10 }
 0x1fd   :  { %1826 = vmatmul.mubr.msk.f32.gmra.mxu1 %vm63_vm0, %v2058_v23 }
 0x1fe   :  { %1266 = vmatprep.mubr.f32.mxu1 %v2968_v10 }
 0x201   :  { %1827 = vmatmul.mubr.msk.f32.gmra.mxu1 %vm63_vm0, %v2066_v24 }
 0x202   :  { %1272 = vmatprep.mubr.f32.mxu1 %v2968_v10 }
 0x205   :  { %1828 = vmatmul.mubr.msk.f32.gmra.mxu1 %vm63_vm0, %v2074_v25 }
 0x206   :  { %1278 = vmatprep.mubr.f32.mxu1 %v2968_v10 }
 0x209   :  { %1829 = vmatmul.mubr.msk.f32.gmra.mxu1 %vm63_vm0, %v2082_v26 }
 0x20a   :  { %1284 = vmatprep.mubr.f32.mxu1 %v2968_v10 }
 0x20d   :  { %1830 = vmatmul.mubr.msk.f32.gmra.mxu1 %vm63_vm0, %v2090_v27 }
 0x20e   :  { %1290 = vmatprep.mubr.f32.mxu1 %v2968_v10 }
 0x211   :  { %1831 = vmatmul.mubr.msk.f32.gmra.mxu1 %vm63_vm0, %v2098_v28 }
 0x212   :  { %1296 = vmatprep.mubr.f32.mxu1 %v2968_v10 }
 0x215   :  { %1832 = vmatmul.mubr.msk.f32.gmra.mxu1 %vm63_vm0, %v2106_v29 }
 0x216   :  { %1302 = vmatprep.mubr.f32.mxu1 %v2968_v10 }
 0x219   :  { %1833 = vmatmul.mubr.msk.f32.gmra.mxu1 %vm63_vm0, %v2114_v30 }
 0x21a   :  { %1308 = vmatprep.mubr.f32.mxu1 %v2968_v10 }
 0x21d   :  { %1834 = vmatmul.mubr.msk.f32.gmra.mxu1 %vm63_vm0, %v2122_v31 }
 0x26d   :  { %v2673_v20 = vpop.f32.mrf.mxu1 }
 0x26f   :  { %v2675_v21 = vpop.f32.mrf.mxu1 }
 0x270   :  { %2970 = vst [vmem:[#allocation28_spill] sm:$0xff] %v2675_v21 }
 0x271   :  { %v2677_v22 = vpop.f32.mrf.mxu1 }
 0x272   :  { %2971 = vst [vmem:[#allocation29_spill] sm:$0xff] %v2677_v22 }
 0x273   :  { %v2679_v23 = vpop.f32.mrf.mxu1 }
 0x274   :  { %2972 = vst [vmem:[#allocation30_spill] sm:$0xff] %v2679_v23 }
 0x275   :  { %v1154_v24 = vpop.f32.mrf.mxu1 }
 0x276   :  { %1320 = vrot.lane.b32.xlu1 %v1154_v24, %s1884_s30 }
 0x277   :  { %v1156_v25 = vpop.f32.mrf.mxu1 }
 0x278   :  { %1316 = vrot.lane.b32.xlu0 %v1156_v25, %s1884_s30  ;;  %s2974_s30 = smov 3  }
 0x279   :  { %v1160_v26 = vpop.f32.mrf.mxu1 }
 0x27a   :  { %1335 = vrot.lane.b32.xlu1 %v1160_v26, %s1885_s6 }
 0x27b   :  { %v1162_v27 = vpop.f32.mrf.mxu1 }
 0x27c   :  { %1331 = vrot.lane.b32.xlu0 %v1162_v27, %s1885_s6  ;;  %s2975_s6 = smov 125  }
 0x27d   :  { %v1166_v28 = vpop.f32.mrf.mxu1 }
 0x27e   :  { %1350 = vrot.lane.b32.xlu1 %v1166_v28, %s1886_s7 }
 0x27f   :  { %v1168_v29 = vpop.f32.mrf.mxu1 }
 0x280   :  { %1346 = vrot.lane.b32.xlu0 %v1168_v29, %s1886_s7  ;;  %s2976_s7 = smov 83  }
 0x281   :  { %v1172_v30 = vpop.f32.mrf.mxu1 }
 0x282   :  { %1365 = vrot.lane.b32.xlu1 %v1172_v30, %s1887_s8 }
 0x283   :  { %v1174_v31 = vpop.f32.mrf.mxu1 }
 0x284   :  { %1361 = vrot.lane.b32.xlu0 %v1174_v31, %s1887_s8  ;;  %s2977_s8 = smov 80  }
 0x285   :  { %v2689_v11 = vpop.f32.mrf.mxu1 }
 0x287   :  { %v2691_v63 = vpop.f32.mrf.mxu1 }
 0x289   :  { %v1184_v5 = vpop.f32.mrf.mxu1 }
 0x28a   :  { %1381 = vrot.lane.b32.xlu0 %v1184_v5, %s1888_s9 }
 0x28b   :  { %v1186_v38 = vpop.f32.mrf.mxu1 }
 0x28c   :  { %1383 = vrot.lane.b32.xlu1 %v1186_v38, %s1888_s9  ;;  %s2978_s9 = smov 77  }
 0x28d   :  { %v1190_v44 = vpop.f32.mrf.mxu1 }
 0x28e   :  { %1396 = vrot.lane.b32.xlu0 %v1190_v44, %s1889_s10 }
 0x28f   :  { %v1192_v3 = vpop.f32.mrf.mxu1 }
 0x290   :  { %1398 = vrot.lane.b32.xlu1 %v1192_v3, %s1889_s10 }
 0x291   :  { %v1196_v47 = vpop.f32.mrf.mxu1 }
 0x292   :  { %1411 = vrot.lane.b32.xlu0 %v1196_v47, %s1890_s11 }
 0x293   :  { %v1198_v46 = vpop.f32.mrf.mxu1 }
 0x294   :  { %1413 = vrot.lane.b32.xlu1 %v1198_v46, %s1890_s11 }
 0x295   :  { %v1202_v52 = vpop.f32.mrf.mxu1 }
 0x296   :  { %1426 = vrot.lane.b32.xlu0 %v1202_v52, %s1891_s12 }
 0x297   :  { %v1204_v12 = vpop.f32.mrf.mxu1 }
 0x298   :  { %1428 = vrot.lane.b32.xlu1 %v1204_v12, %s1891_s12 }
 0x299   :  { %v1208_v8 = vpop.f32.mrf.mxu1 }
 0x29b   :  { %v1210_v59 = vpop.f32.mrf.mxu1 }
 0x29c   :  { %1444 = vrot.lane.b32.xlu1 %v1208_v8, %s1892_s13  ;;  %1440 = vrot.lane.b32.xlu0 %v1210_v59, %s1892_s13 }
 0x29d   :  { %v1214_v16 = vpop.f32.mrf.mxu1 }
 0x29f   :  { %v1216_v39 = vpop.f32.mrf.mxu1 }
 0x2a0   :  { %1459 = vrot.lane.b32.xlu1 %v1214_v16, %s1893_s14  ;;  %1455 = vrot.lane.b32.xlu0 %v1216_v39, %s1893_s14 }
 0x2a1   :  { %v1220_v50 = vpop.f32.mrf.mxu1 }
 0x2a3   :  { %v1222_v17 = vpop.f32.mrf.mxu1 }
 0x2a4   :  { %1474 = vrot.lane.b32.xlu1 %v1220_v50, %s1894_s15  ;;  %1470 = vrot.lane.b32.xlu0 %v1222_v17, %s1894_s15 }
 0x2a5   :  { %v1226_v60 = vpop.f32.mrf.mxu1 }
 0x2a7   :  { %v1228_v15 = vpop.f32.mrf.mxu1 }
 0x2a8   :  { %1489 = vrot.lane.b32.xlu1 %v1226_v60, %s1895_s16  ;;  %1485 = vrot.lane.b32.xlu0 %v1228_v15, %s1895_s16 }
 0x2a9   :  { %v2709_v42 = vpop.f32.mrf.mxu1 }
 0x2ab   :  { %v2711_v19 = vpop.f32.mrf.mxu1 }
 0x2ad   :  { %v1238_v24 = vpop.f32.mrf.mxu1 }
 0x2ae   :  { %1505 = vrot.lane.b32.xlu0 %v1238_v24, %s1896_s17 }
 0x2af   :  { %v1240_v25 = vpop.f32.mrf.mxu1 }
 0x2b0   :  { %1507 = vrot.lane.b32.xlu1 %v1240_v25, %s1896_s17 }
 0x2b1   :  { %v1244_v26 = vpop.f32.mrf.mxu1 }
 0x2b2   :  { %1520 = vrot.lane.b32.xlu0 %v1244_v26, %s1897_s18  ;;  %v49_v26 = vld [vmem:[%s2892_s3] sm:$0xff] }
 0x2b3   :  { %v1246_v27 = vpop.f32.mrf.mxu1 }
 0x2b4   :  { %1522 = vrot.lane.b32.xlu1 %v1246_v27, %s1897_s18  ;;  %v50_v27 = vld [vmem:[%s2892_s3 + $0x8] sm:$0xff] }
 0x2b5   :  { %v1250_v28 = vpop.f32.mrf.mxu1 }
 0x2b6   :  { %1535 = vrot.lane.b32.xlu0 %v1250_v28, %s1898_s19 }
 0x2b7   :  { %v1252_v29 = vpop.f32.mrf.mxu1 }
 0x2b8   :  { %1537 = vrot.lane.b32.xlu1 %v1252_v29, %s1898_s19 }
 0x2b9   :  { %v1256_v30 = vpop.f32.mrf.mxu1 }
 0x2ba   :  { %1550 = vrot.lane.b32.xlu0 %v1256_v30, %s1899_s20 }
 0x2bb   :  { %v1258_v31 = vpop.f32.mrf.mxu1 }
 0x2bc   :  { %1552 = vrot.lane.b32.xlu1 %v1258_v31, %s1899_s20 }
 0x2bd   :  { %v1262_v5 = vpop.f32.mrf.mxu1 }
 0x2bf   :  { %v1264_v38 = vpop.f32.mrf.mxu1 }
 0x2c0   :  { %1568 = vrot.lane.b32.xlu1 %v1262_v5, %s1900_s21  ;;  %1564 = vrot.lane.b32.xlu0 %v1264_v38, %s1900_s21 }
 0x2c1   :  { %v1268_v44 = vpop.f32.mrf.mxu1 }
 0x2c3   :  { %v1270_v3 = vpop.f32.mrf.mxu1 }
 0x2c4   :  { %1583 = vrot.lane.b32.xlu1 %v1268_v44, %s1901_s22  ;;  %1579 = vrot.lane.b32.xlu0 %v1270_v3, %s1901_s22 }
 0x2c5   :  { %v1274_v47 = vpop.f32.mrf.mxu1 }
 0x2c7   :  { %v1276_v46 = vpop.f32.mrf.mxu1 }
 0x2c8   :  { %1598 = vrot.lane.b32.xlu1 %v1274_v47, %s2973_s1  ;;  %1594 = vrot.lane.b32.xlu0 %v1276_v46, %s2973_s1 }
 0x2c9   :  { %v1280_v52 = vpop.f32.mrf.mxu1 }
 0x2cb   :  { %v1282_v12 = vpop.f32.mrf.mxu1 }
 0x2cc   :  { %1613 = vrot.lane.b32.xlu1 %v1280_v52, %s2974_s30  ;;  %1609 = vrot.lane.b32.xlu0 %v1282_v12, %s2974_s30 }
 0x2cd   :  { %v2729_v8 = vpop.f32.mrf.mxu1 }
 0x2cf   :  { %v2731_v59 = vpop.f32.mrf.mxu1 }
 0x2d1   :  { %v1292_v16 = vpop.f32.mrf.mxu1 }
 0x2d2   :  { %1629 = vrot.lane.b32.xlu0 %v1292_v16, %s2975_s6 }
 0x2d3   :  { %v1294_v39 = vpop.f32.mrf.mxu1 }
 0x2d4   :  { %1631 = vrot.lane.b32.xlu1 %v1294_v39, %s2975_s6 }
 0x2d5   :  { %v1298_v50 = vpop.f32.mrf.mxu1 }
 0x2d6   :  { %1644 = vrot.lane.b32.xlu0 %v1298_v50, %s2976_s7 }
 0x2d7   :  { %v1300_v17 = vpop.f32.mrf.mxu1 }
 0x2d8   :  { %1646 = vrot.lane.b32.xlu1 %v1300_v17, %s2976_s7 }
 0x2d9   :  { %v1304_v60 = vpop.f32.mrf.mxu1 }
 0x2da   :  { %1659 = vrot.lane.b32.xlu0 %v1304_v60, %s2977_s8 }
 0x2db   :  { %v1306_v15 = vpop.f32.mrf.mxu1 }
 0x2dc   :  { %1661 = vrot.lane.b32.xlu1 %v1306_v15, %s2977_s8 }
 0x2dd   :  { %v1310_v24 = vpop.f32.mrf.mxu1 }
 0x2de   :  { %1674 = vrot.lane.b32.xlu0 %v1310_v24, %s2978_s9 }
 0x2df   :  { %v1312_v25 = vpop.f32.mrf.mxu1 }
 0x2e0   :  { %1676 = vrot.lane.b32.xlu1 %v1312_v25, %s2978_s9 }
 0x2e2   :  { %987 = vperm.xlu0 %1867, %v49_v26  }
 0x2e4   :  { %992 = vperm.xlu1 %1868, %v50_v27  }
 0x2e8   :  { %v1321_v28 = vpop.permute.xlu1 %1320 }
 0x2ea   :  { %v1317_v29 = vpop.permute.xlu0 %1316 }
 0x2eb   :  { %v1322_v39 = vsel %vm379_vm1, %v1321_v28, %v1317_v29  ;;  %v1325_v50 = vsel %vm379_vm1, %v1317_v29, %v1321_v28 }
 0x2ec   :  { %v1336_v30 = vpop.permute.xlu1 %1335 }
 0x2ee   :  { %v1332_v31 = vpop.permute.xlu0 %1331 }
 0x2ef   :  { %v1337_v52 = vsel %vm63_vm0, %v1336_v30, %v1332_v31  ;;  %v1340_v12 = vsel %vm63_vm0, %v1332_v31, %v1336_v30  ;;  %v1326_v30 = vmul.f32 %v1325_v50, %v2210_v61  ;;  %v1327_v31 = vmul.f32 %v1322_v39, %v2215_v0 }
 0x2f0   :  { %v1351_v38 = vpop.permute.xlu1 %1350  ;;  %v1341_v15 = vmul.f32 %v1340_v12, %v2200_v54  ;;  %v1342_v24 = vmul.f32 %v1337_v52, %v2203_v55  ;;  %v2980_v12 = vld [vmem:[#allocation3_spill] sm:$0xff]  ;;  %vm2997_vm0 = vcmask 801792  }
 0x2f1   :  { %vm2998_vm1 = vmmov %vm2997_vm0 }
 0x2f2   :  { %v1347_v5 = vpop.permute.xlu0 %1346  ;;  %v1343_v23 = vadd.f32 %v1341_v15, %v1326_v30  ;;  %v2982_v15 = vld [vmem:[#allocation5_spill] sm:$0xff] }
 0x2f3   :  { %v1352_v17 = vsel %vm426_vm2, %v1351_v38, %v1347_v5  ;;  %v1355_v60 = vsel %vm426_vm2, %v1347_v5, %v1351_v38  ;;  %v1344_v5 = vadd.f32 %v1342_v24, %v1327_v31  ;;  %v2979_v38 = vld [vmem:[#allocation2_spill] sm:$0xff]  ;;  %v1376_v24 = vmul.f32 %v2691_v63, %v2982_v15 }
 0x2f4   :  { %v1366_v3 = vpop.permute.xlu1 %1365  ;;  %v1356_v51 = vmul.f32 %v1355_v60, %v2218_v1  ;;  %v1357_v28 = vmul.f32 %v1352_v17, %v2221_v2  ;;  %v2981_v17 = vld [vmem:[#allocation4_spill] sm:$0xff]  ;;  %vm3001_vm2 = vcmask 785408  }
 0x2f5   :  { %v1375_v60 = vmul.f32 %v2689_v11, %v2981_v17 }
 0x2f6   :  { %v1362_v44 = vpop.permute.xlu0 %1361  ;;  %v1358_v22 = vadd.f32 %v1356_v51, %v1343_v23  ;;  %v1359_v21 = vadd.f32 %v1357_v28, %v1344_v5  ;;  %v2983_v51 = vld [vmem:[#allocation6_spill] sm:$0xff] }
 0x2f7   :  { %v1367_v26 = vsel %vm450_vm3, %v1366_v3, %v1362_v44  ;;  %v1370_v27 = vsel %vm450_vm3, %v1362_v44, %v1366_v3  ;;  %vm3002_vm3 = vmmov %vm3001_vm2 }
 0x2f8   :  { %v1371_v54 = vmul.f32 %v1370_v27, %v2979_v38  ;;  %v1372_v55 = vmul.f32 %v1367_v26, %v2980_v12  ;;  %v2984_v26 = vld [vmem:[#allocation7_spill] sm:$0xff] }
 0x2fa   :  { %v1373_v3 = vadd.f32 %v1371_v54, %v1358_v22  ;;  %v1374_v0 = vadd.f32 %v1372_v55, %v1359_v21  ;;  %v2985_v54 = vld [vmem:[#allocation8_spill] sm:$0xff] }
 0x2fc   :  { %v1382_v47 = vpop.permute.xlu0 %1381  ;;  %v1377_v22 = vadd.f32 %v1375_v60, %v1373_v3  ;;  %v2988_v60 = vld [vmem:[#allocation11_spill] sm:$0xff] }
 0x2fe   :  { %v1384_v46 = vpop.permute.xlu1 %1383 }
 0x2ff   :  { %v1385_v44 = vsel %vm485_vm4, %v1382_v47, %v1384_v46  ;;  %v1389_v61 = vsel %vm485_vm4, %v1384_v46, %v1382_v47  ;;  %v1378_v46 = vadd.f32 %v1376_v24, %v1374_v0  ;;  %vm3005_vm4 = vcmask 769024  }
 0x300   :  { %v1397_v16 = vpop.permute.xlu0 %1396  ;;  %v1390_v23 = vmul.f32 %v1385_v44, %v2983_v51  ;;  %v1391_v27 = vmul.f32 %v1389_v61, %v2984_v26  ;;  %v2986_v44 = vld [vmem:[#allocation9_spill] sm:$0xff]  ;;  %v2987_v61 = vld [vmem:[#allocation10_spill] sm:$0xff] }
 0x302   :  { %v1399_v25 = vpop.permute.xlu1 %1398  ;;  %v1392_v28 = vadd.f32 %v1390_v23, %v1377_v22  ;;  %v1393_v5 = vadd.f32 %v1391_v27, %v1378_v46  ;;  %v2989_v23 = vld [vmem:[#allocation12_spill] sm:$0xff]  ;;  %v2990_v27 = vld [vmem:[#allocation13_spill] sm:$0xff] }
 0x303   :  { %v1400_v2 = vsel %vm509_vm5, %v1397_v16, %v1399_v25  ;;  %v1404_v50 = vsel %vm509_vm5, %v1399_v25, %v1397_v16  ;;  %vm3006_vm5 = vmmov %vm3005_vm4 }
 0x304   :  { %v1412_v29 = vpop.permute.xlu0 %1411  ;;  %v1405_v30 = vmul.f32 %v1400_v2, %v2262_v6  ;;  %v1406_v16 = vmul.f32 %v1404_v50, %v2267_v9 }
 0x306   :  { %v1414_v52 = vpop.permute.xlu1 %1413  ;;  %v1408_v6 = vadd.f32 %v1406_v16, %v1393_v5 }
 0x307   :  { %v1415_v47 = vsel %vm533_vm6, %v1412_v29, %v1414_v52  ;;  %v1419_v21 = vsel %vm533_vm6, %v1414_v52, %v1412_v29  ;;  %v1407_v52 = vadd.f32 %v1405_v30, %v1392_v28  ;;  %vm3007_vm6 = vcmask 416768  }
 0x308   :  { %v1427_v39 = vpop.permute.xlu0 %1426  ;;  %v1420_v38 = vmul.f32 %v1415_v47, %v2272_v32  ;;  %v1421_v12 = vmul.f32 %v1419_v21, %v2985_v54 }
 0x30a   :  { %v1429_v1 = vpop.permute.xlu1 %1428  ;;  %v1422_v50 = vadd.f32 %v1420_v38, %v1407_v52  ;;  %v1423_v32 = vadd.f32 %v1421_v12, %v1408_v6  ;;  %v2993_v6 = vld [vmem:[#allocation16_spill] sm:$0xff] }
 0x30b   :  { %v1430_v11 = vsel %vm557_vm7, %v1427_v39, %v1429_v1  ;;  %v1434_v63 = vsel %vm557_vm7, %v1429_v1, %v1427_v39  ;;  %vm3008_vm7 = vmmov %vm3007_vm6 }
 0x30c   :  { %v1435_v9 = vmul.f32 %v1430_v11, %v2986_v44  ;;  %v1436_v3 = vmul.f32 %v1434_v63, %v2987_v61  ;;  %v2992_v63 = vld [vmem:[#allocation15_spill] sm:$0xff] }
 0x30e   :  { %v1445_v25 = vpop.permute.xlu1 %1444  ;;  %v1441_v31 = vpop.permute.xlu0 %1440  ;;  %v1437_v24 = vadd.f32 %v1435_v9, %v1422_v50  ;;  %v1438_v51 = vadd.f32 %v1436_v3, %v1423_v32  ;;  %v2994_v9 = vld [vmem:[#allocation17_spill] sm:$0xff]  ;;  %v2995_v3 = vld [vmem:[#allocation18_spill] sm:$0xff] }
 0x30f   :  { %v1446_v29 = vsel %vm582_vm8, %v1445_v25, %v1441_v31  ;;  %v1449_v55 = vsel %vm582_vm8, %v1441_v31, %v1445_v25  ;;  %v2991_v31 = vld [vmem:[#allocation14_spill] sm:$0xff]  ;;  %vm3010_vm8 = vcmask 392192  }
 0x310   :  { %v1450_v17 = vmul.f32 %v1449_v55, %v2305_v4  ;;  %v1451_v15 = vmul.f32 %v1446_v29, %v2988_v60 }
 0x312   :  { %v1460_v0 = vpop.permute.xlu1 %1459  ;;  %v1456_v2 = vpop.permute.xlu0 %1455  ;;  %v1452_v16 = vadd.f32 %v1450_v17, %v1437_v24  ;;  %v1453_v25 = vadd.f32 %v1451_v15, %v1438_v51 }
 0x313   :  { %v1461_v39 = vsel %vm606_vm9, %v1460_v0, %v1456_v2  ;;  %v1464_v1 = vsel %vm606_vm9, %v1456_v2, %v1460_v0  ;;  %v1499_v0 = vmul.f32 %v2709_v42, %v2995_v3  ;;  %v2996_v2 = vld [vmem:[#allocation19_spill] sm:$0xff]  ;;  %vm3011_vm9 = vmmov %vm3010_vm8 }
 0x314   :  { %v1465_v26 = vmul.f32 %v1464_v1, %v2989_v23  ;;  %v1466_v47 = vmul.f32 %v1461_v39, %v2990_v27  ;;  %v1500_v39 = vmul.f32 %v2711_v19, %v2996_v2 }
 0x316   :  { %v1475_v21 = vpop.permute.xlu1 %1474  ;;  %v1471_v22 = vpop.permute.xlu0 %1470  ;;  %v1467_v28 = vadd.f32 %v1465_v26, %v1452_v16  ;;  %v1468_v5 = vadd.f32 %v1466_v47, %v1453_v25  ;;  %v3000_v16 = vld [vmem:[#allocation21_spill] sm:$0xff] }
 0x317   :  { %v1476_v46 = vsel %vm630_vm10, %v1475_v21, %v1471_v22  ;;  %v1479_v30 = vsel %vm630_vm10, %v1471_v22, %v1475_v21  ;;  %vm3012_vm10 = vcmask 367616  }
 0x318   :  { %v1480_v11 = vmul.f32 %v1479_v30, %v2991_v31  ;;  %v1481_v4 = vmul.f32 %v1476_v46, %v2992_v63  ;;  %v2999_v46 = vld [vmem:[#allocation20_spill] sm:$0xff]  ;;  %v3003_v63 = vld [vmem:[#allocation22_spill] sm:$0xff] }
 0x31a   :  { %v1490_v38 = vpop.permute.xlu1 %1489  ;;  %v1486_v54 = vpop.permute.xlu0 %1485  ;;  %v1482_v55 = vadd.f32 %v1480_v11, %v1467_v28  ;;  %v1483_v52 = vadd.f32 %v1481_v4, %v1468_v5  ;;  %v3004_v28 = vld [vmem:[#allocation23_spill] sm:$0xff] }
 0x31b   :  { %v1491_v12 = vsel %vm654_vm11, %v1490_v38, %v1486_v54  ;;  %v1494_v29 = vsel %vm654_vm11, %v1486_v54, %v1490_v38  ;;  %vm3013_vm11 = vmmov %vm3012_vm10 }
 0x31c   :  { %v1495_v44 = vmul.f32 %v1494_v29, %v2993_v6  ;;  %v1496_v61 = vmul.f32 %v1491_v12, %v2994_v9 }
 0x31e   :  { %v1497_v1 = vadd.f32 %v1495_v44, %v1482_v55  ;;  %v1498_v50 = vadd.f32 %v1496_v61, %v1483_v52 }
 0x320   :  { %v1506_v32 = vpop.permute.xlu0 %1505  ;;  %v1501_v17 = vadd.f32 %v1499_v0, %v1497_v1  ;;  %v1502_v60 = vadd.f32 %v1500_v39, %v1498_v50  ;;  %v3009_v39 = vld [vmem:[#allocation24_spill] sm:$0xff] }
 0x322   :  { %v1508_v15 = vpop.permute.xlu1 %1507 }
 0x323   :  { %v1509_v27 = vsel %vm689_vm12, %v1506_v32, %v1508_v15  ;;  %v1513_v47 = vsel %vm689_vm12, %v1508_v15, %v1506_v32  ;;  %vm3014_vm12 = vcmask 23552  }
 0x324   :  { %v1521_v24 = vpop.permute.xlu0 %1520  ;;  %v1514_v30 = vmul.f32 %v1509_v27, %v2999_v46  ;;  %v1515_v25 = vmul.f32 %v1513_v47, %v3000_v16 }
 0x326   :  { %v1523_v51 = vpop.permute.xlu1 %1522  ;;  %v1516_v55 = vadd.f32 %v1514_v30, %v1501_v17  ;;  %v1517_v52 = vadd.f32 %v1515_v25, %v1502_v60 }
 0x327   :  { %v1524_v42 = vsel %vm2997_vm0, %v1521_v24, %v1523_v51  ;;  %v1528_v19 = vsel %vm2998_vm1, %v1523_v51, %v1521_v24  ;;  %vm3015_vm0 = vmmov %vm3014_vm12  ;;  %vm3016_vm1 = vcmask 1022976  }
 0x328   :  { %v1536_v23 = vpop.permute.xlu0 %1535  ;;  %v1529_v4 = vmul.f32 %v1524_v42, %v3003_v63  ;;  %v1530_v5 = vmul.f32 %v1528_v19, %v3004_v28  ;;  %v1623_v28 = vmul.f32 %v2729_v8, %v2475_v36 }
 0x32a   :  { %v1538_v26 = vpop.permute.xlu1 %1537  ;;  %v1531_v3 = vadd.f32 %v1529_v4, %v1516_v55  ;;  %v1532_v0 = vadd.f32 %v1530_v5, %v1517_v52 }
 0x32b   :  { %v1539_v31 = vsel %vm3001_vm2, %v1536_v23, %v1538_v26  ;;  %v1543_v11 = vsel %vm3002_vm3, %v1538_v26, %v1536_v23  ;;  %vm3017_vm2 = vmmov %vm3016_vm1  ;;  %vm3020_vm3 = vcmask 654336  }
 0x32c   :  { %v1551_v21 = vpop.permute.xlu0 %1550  ;;  %v1544_v6 = vmul.f32 %v1539_v31, %v2403_v18  ;;  %v1545_v44 = vmul.f32 %v1543_v11, %v2407_v53 }
 0x32e   :  { %v1553_v22 = vpop.permute.xlu1 %1552  ;;  %v1546_v60 = vadd.f32 %v1544_v6, %v1531_v3  ;;  %v1547_v18 = vadd.f32 %v1545_v44, %v1532_v0 }
 0x32f   :  { %v1554_v12 = vsel %vm3005_vm4, %v1551_v21, %v1553_v22  ;;  %v1558_v29 = vsel %vm3006_vm5, %v1553_v22, %v1551_v21  ;;  %vm3021_vm4 = vmmov %vm3020_vm3 }
 0x330   :  { %v1559_v2 = vmul.f32 %v1554_v12, %v2413_v37  ;;  %v1560_v1 = vmul.f32 %v1558_v29, %v3009_v39 }
 0x332   :  { %v1569_v38 = vpop.permute.xlu1 %1568  ;;  %v1565_v54 = vpop.permute.xlu0 %1564  ;;  %v1561_v51 = vadd.f32 %v1559_v2, %v1546_v60  ;;  %v1562_v23 = vadd.f32 %v1560_v1, %v1547_v18 }
 0x333   :  { %v1570_v9 = vsel %vm3007_vm6, %v1569_v38, %v1565_v54  ;;  %v1573_v61 = vsel %vm3008_vm7, %v1565_v54, %v1569_v38 }
 0x334   :  { %v1574_v53 = vmul.f32 %v1573_v61, %v2425_v7  ;;  %v1575_v24 = vmul.f32 %v1570_v9, %v2429_v58  ;;  %v3019_v61 = vld [vmem:[#allocation26_spill] sm:$0xff] }
 0x336   :  { %v1584_v50 = vpop.permute.xlu1 %1583  ;;  %v1580_v32 = vpop.permute.xlu0 %1579  ;;  %v1576_v42 = vadd.f32 %v1574_v53, %v1561_v51  ;;  %v1577_v19 = vadd.f32 %v1575_v24, %v1562_v23 }
 0x337   :  { %v1585_v15 = vsel %vm3010_vm8, %v1584_v50, %v1580_v32  ;;  %v1588_v17 = vsel %vm3011_vm9, %v1580_v32, %v1584_v50 }
 0x338   :  { %v1589_v26 = vmul.f32 %v1588_v17, %v2435_v57  ;;  %v1590_v37 = vmul.f32 %v1585_v15, %v2443_v62 }
 0x33a   :  { %v1599_v27 = vpop.permute.xlu1 %1598  ;;  %v1595_v47 = vpop.permute.xlu0 %1594  ;;  %v1591_v30 = vadd.f32 %v1589_v26, %v1576_v42  ;;  %v1592_v58 = vadd.f32 %v1590_v37, %v1577_v19 }
 0x33b   :  { %v1600_v21 = vsel %vm3012_vm10, %v1599_v27, %v1595_v47  ;;  %v1603_v22 = vsel %vm3013_vm11, %v1595_v47, %v1599_v27 }
 0x33c   :  { %v1604_v46 = vmul.f32 %v1603_v22, %v2451_v48  ;;  %v1605_v7 = vmul.f32 %v1600_v21, %v2455_v56  ;;  %v1624_v48 = vmul.f32 %v2731_v59, %v2479_v35  ;;  %v3018_v59 = vld [vmem:[#allocation25_spill] sm:$0xff]  ;;  %v3022_v22 = vld [vmem:[#allocation28_spill] sm:$0xff] }
 0x33e   :  { %v1614_v16 = vpop.permute.xlu1 %1613  ;;  %v1610_v25 = vpop.permute.xlu0 %1609  ;;  %v1606_v31 = vadd.f32 %v1604_v46, %v1591_v30  ;;  %v1607_v11 = vadd.f32 %v1605_v7, %v1592_v58  ;;  %v3024_v46 = vld [vmem:[#allocation30_spill] sm:$0xff]  ;;  %v3025_v7 = vld [vmem:[#allocation27_spill] sm:$0xff] }
 0x33f   :  { %v1615_v57 = vsel %vm3014_vm12, %v1614_v16, %v1610_v25  ;;  %v1618_v62 = vsel %vm3015_vm0, %v1610_v25, %v1614_v16 }
 0x340   :  { %v1619_v63 = vmul.f32 %v1618_v62, %v2465_v41  ;;  %v1620_v4 = vmul.f32 %v1615_v57, %v2469_v45 }
 0x342   :  { %v1621_v56 = vadd.f32 %v1619_v63, %v1606_v31  ;;  %v1622_v5 = vadd.f32 %v1620_v4, %v1607_v11 }
 0x344   :  { %v1630_v38 = vpop.permute.xlu0 %1629  ;;  %v1625_v54 = vadd.f32 %v1623_v28, %v1621_v56  ;;  %v1626_v12 = vadd.f32 %v1624_v48, %v1622_v5 }
 0x346   :  { %v1632_v29 = vpop.permute.xlu1 %1631 }
 0x347   :  { %v1633_v52 = vsel %vm3016_vm1, %v1630_v38, %v1632_v29  ;;  %v1637_v6 = vsel %vm3017_vm2, %v1632_v29, %v1630_v38 }
 0x348   :  { %v1645_v55 = vpop.permute.xlu0 %1644  ;;  %v1638_v36 = vmul.f32 %v1633_v52, %v2497_v13  ;;  %v1639_v35 = vmul.f32 %v1637_v6, %v2501_v14 }
 0x34a   :  { %v1647_v41 = vpop.permute.xlu1 %1646  ;;  %v1640_v1 = vadd.f32 %v1638_v36, %v1625_v54  ;;  %v1641_v50 = vadd.f32 %v1639_v35, %v1626_v12 }
 0x34b   :  { %v1648_v45 = vsel %vm917_vm13, %v1645_v55, %v1647_v41  ;;  %v1652_v44 = vsel %vm917_vm13, %v1647_v41, %v1645_v55 }
 0x34c   :  { %v1660_v8 = vpop.permute.xlu0 %1659  ;;  %v1653_v9 = vmul.f32 %v1648_v45, %v3018_v59  ;;  %v1654_v3 = vmul.f32 %v1652_v44, %v3019_v61 }
 0x34e   :  { %v1662_v0 = vpop.permute.xlu1 %1661  ;;  %v1655_v17 = vadd.f32 %v1653_v9, %v1640_v1  ;;  %v1656_v13 = vadd.f32 %v1654_v3, %v1641_v50 }
 0x34f   :  { %v1663_v2 = vsel %vm3020_vm3, %v1660_v8, %v1662_v0  ;;  %v1667_v39 = vsel %vm3021_vm4, %v1662_v0, %v1660_v8 }
 0x350   :  { %v1668_v32 = vmul.f32 %v1663_v2, %v2516_v34  ;;  %v1669_v15 = vmul.f32 %v1667_v39, %v2519_v43  ;;  %v1675_v60 = vpop.permute.xlu0 %1674 }
 0x352   :  { %v1677_v14 = vpop.permute.xlu1 %1676  ;;  %v1670_v24 = vadd.f32 %v1668_v32, %v1655_v17  ;;  %v1671_v51 = vadd.f32 %v1669_v15, %v1656_v13 }
 0x353   :  { %v1678_v18 = vsel %vm965_vm15, %v1675_v60, %v1677_v14  ;;  %v1682_v53 = vsel %vm965_vm15, %v1677_v14, %v1675_v60 }
 0x354   :  { %v1683_v23 = vmul.f32 %v1678_v18, %v2526_v40  ;;  %v1684_v26 = vmul.f32 %v1682_v53, %v2529_v33  ;;  %v3023_v40 = vld [vmem:[#allocation29_spill] sm:$0xff] }
 0x356   :  { %v1685_v37 = vadd.f32 %v1683_v23, %v1670_v24  ;;  %v1686_v27 = vadd.f32 %v1684_v26, %v1671_v51 }
 0x358   :  { %v1687_v47 = vmax.f32 %v1685_v37, 0.0  ;;  %v1688_v34 = vmax.f32 %v1686_v27, 0.0 }
 0x35a   :  { %1719 = vmatprep.subr.mxu0 %v1688_v34 }
 0x35b   :  { %1720 = vmatpush1.msra.mxu0 %v1687_v47 }
 0x35c   :  { %1835 = vmatmul.mubr.msk.f32.vlgmr.msra.gmra.mxu0 %vm995_vm14, %v2540_v49 }
 0x35d   :  { %v988_v43 = vpop.permute.xlu0 %987  ;;  %1759 = vmatprep.mubr.f32.mxu0 %v2968_v10 }
 0x35e   :  { %v1069_v21 = vadd.f32 %v2673_v20, %v988_v43  ;;  %v1071_v42 = vadd.f32 %v3022_v22, %v988_v43 }
 0x35f   :  { %v993_v19 = vpop.permute.xlu1 %992 }
 0x360   :  { %1079 = vst [vmem:[%s2893_s5] sm:$0xff] %v1069_v21  ;;  %1080 = vst [vmem:[%s2893_s5 + $0x8] sm:$0xff] %v1071_v42  ;;  %v1075_v33 = vadd.f32 %v3023_v40, %v993_v19  ;;  %v1077_v49 = vadd.f32 %v3024_v46, %v993_v19  ;;  %1836 = vmatmul.mubr.msk.f32.gmra.mxu0 %vm995_vm14, %v3025_v7 }
 0x362   :  { %1081 = vst [vmem:[%s2893_s5 + $0x10] sm:$0xff] %v1075_v33  ;;  %1082 = vst [vmem:[%s2893_s5 + $0x18] sm:$0xff] %v1077_v49 }
 0x41c   :  { %v1755_v10 = vpop.f32.mrf.mxu0 }
 0x41d   :  { %v1756_v20 = vadd.f32 %v1755_v10, %v988_v43 }
 0x41e   :  { %v1757_v30 = vpop.f32.mrf.mxu0 }
 0x41f   :  { %1837 = vst [vmem:[%s2893_s5 + $0x20] sm:$0xff] %v1756_v20  ;;  %v1758_v58 = vadd.f32 %v1757_v30, %v988_v43 }
 0x420   :  { %v1761_v16 = vpop.f32.mrf.mxu0 }
 0x421   :  { %1838 = vst [vmem:[%s2893_s5 + $0x28] sm:$0xff] %v1758_v58  ;;  %v1762_v25 = vadd.f32 %v1761_v16, %v993_v19 }
 0x422   :  { %v1763_v57 = vpop.f32.mrf.mxu0 }
 0x423   :  { %1839 = vst [vmem:[%s2893_s5 + $0x30] sm:$0xff] %v1762_v25  ;;  %v1764_v62 = vadd.f32 %v1763_v57, %v993_v19 }
 0x425   :  { %1840 = vst [vmem:[%s2893_s5 + $0x38] sm:$0xff] %v1764_v62 }

</bundles_post_ra>
